<compile_context>
chip_gen: v7x
topology: tpu7x:2x2x1
jax: 0.10.0
libtpu: 0.0.40
codegen_flags: <defaults>
</compile_context>

<pallas_src>
import jax
import jax.numpy as jnp
from jax.experimental import pallas as pl
from jax.experimental.pallas import tpu as pltpu

NUM_CLASSES = 10
INPUT_SIZE = (1, 28, 28)                                      # (C, H, W)
IMG_FEATURES = INPUT_SIZE[0] * INPUT_SIZE[1] * INPUT_SIZE[2]  # 784
HIDDEN = 512
BLOCK_B = 1024           # batch tile; ~11 MB VMEM peak -> safe on v7x's 64 MiB


def _round_up(x, m):
    return ((x + m - 1) // m) * m


def _leaky_relu(x, slope=0.2):
    return jnp.where(x > 0, x, slope * x)


def disc_kernel(img_ref, emb_ref,
                w1i_ref, w1l_ref, b1_ref,
                w2_ref, b2_ref,
                w3_ref, b3_ref,
                w4_ref, b4_ref,
                o_ref):
    # Layer 1: Linear(794 -> 512), split into image (784) and label-embedding (10) parts.
    x_img = img_ref[...].astype(jnp.bfloat16)
    x_lab = emb_ref[...].astype(jnp.bfloat16)
    h = (jnp.dot(x_img, w1i_ref[...], preferred_element_type=jnp.float32)
         + jnp.dot(x_lab, w1l_ref[...], preferred_element_type=jnp.float32)
         + b1_ref[...])
    h = _leaky_relu(h)

    # Layer 2: Linear(512 -> 512) + Dropout(eval identity) + LeakyReLU(0.2)
    # TODO(synk): Dropout(0.4) implemented as inference-mode identity (no RNG masking).
    h = jnp.dot(h.astype(jnp.bfloat16), w2_ref[...],
                preferred_element_type=jnp.float32) + b2_ref[...]
    h = _leaky_relu(h)

    # Layer 3: Linear(512 -> 512) + Dropout(eval identity) + LeakyReLU(0.2)
    h = jnp.dot(h.astype(jnp.bfloat16), w3_ref[...],
                preferred_element_type=jnp.float32) + b3_ref[...]
    h = _leaky_relu(h)

    # Layer 4: Linear(512 -> 1) + Sigmoid; narrow (tb, 1) column store.
    logits = jnp.dot(h.astype(jnp.bfloat16), w4_ref[...],
                     preferred_element_type=jnp.float32) + b4_ref[...]
    o_ref[...] = pl.reciprocal(1.0 + jnp.exp(-logits), approx=True)   # EUP exp + rcp


@jax.jit
def discriminator_forward(img, labels, params):
    """img: (B, 1, 28, 28) float, labels: (B,) int32 -> (B, 1) f32 in (0, 1)."""
    B = img.shape[0]
    # Keep the incoming dtype (no standalone astype -> no extra HBM pass); the
    # reshape is a layout no-op.
    flat = img.reshape(B, IMG_FEATURES)
    emb = params["emb"][labels]                                  # (B, 10) gather

    # Batch tile: as large as possible (amortize per-grid-step cost), but make
    # sure the grid has >= 2 steps when B allows so both v7x TCs get work.
    tb = min(BLOCK_B, _round_up(B, 8))
    if pl.cdiv(B, tb) < 2 and tb >= 16:
        tb = _round_up(tb // 2, 8)
    n_tiles = pl.cdiv(B, tb)                                     # partial last block OK

    def row_spec(cols):
        return pl.BlockSpec((tb, cols), lambda i: (i, 0))

    def const_spec(shape):  # weights/biases: same block every grid step -> stay resident
        return pl.BlockSpec(shape, lambda i: (0, 0))

    out = pl.pallas_call(
        disc_kernel,
        out_shape=jax.ShapeDtypeStruct((B, 1), jnp.float32),
        grid_spec=pltpu.PrefetchScalarGridSpec(
            num_scalar_prefetch=0,
            grid=(n_tiles,),
            in_specs=[
                row_spec(IMG_FEATURES),                # flat img   (tb, 784)
                row_spec(NUM_CLASSES),                 # embedding  (tb, 10)
                const_spec((IMG_FEATURES, HIDDEN)),    # w1_img     bf16
                const_spec((NUM_CLASSES, HIDDEN)),     # w1_lab     bf16
                const_spec((1, HIDDEN)),               # b1         f32
                const_spec((HIDDEN, HIDDEN)),          # w2         bf16
                const_spec((1, HIDDEN)),               # b2         f32
                const_spec((HIDDEN, HIDDEN)),          # w3         bf16
                const_spec((1, HIDDEN)),               # b3         f32
                const_spec((HIDDEN, 1)),               # w4         bf16
                const_spec((1, 1)),                    # b4         f32
            ],
            out_specs=pl.BlockSpec((tb, 1), lambda i: (i, 0)),
        ),
        compiler_params=pltpu.CompilerParams(
            dimension_semantics=("parallel",),
            vmem_limit_bytes=32 * 1024 * 1024,
        ),
    )(flat, emb,
      params["w1_img"], params["w1_lab"], params["b1"],
      params["w2"], params["b2"],
      params["w3"], params["b3"],
      params["w4"], params["b4"])
    return out


def init_params(key):
    ks = jax.random.split(key, 9)
    scale = 0.02
    # nn.Linear(794, 512): rows 0..783 multiply the flattened image, rows 784..793 the embedding.
    w1 = scale * jax.random.normal(ks[0], (IMG_FEATURES + NUM_CLASSES, HIDDEN), jnp.float32)
    return {
        "emb": scale * jax.random.normal(ks[1], (NUM_CLASSES, NUM_CLASSES), jnp.float32),
        # Weights in bf16 (kernel is weight-bandwidth bound at small B); biases f32.
        "w1_img": w1[:IMG_FEATURES].astype(jnp.bfloat16),
        "w1_lab": w1[IMG_FEATURES:].astype(jnp.bfloat16),
        "b1": scale * jax.random.normal(ks[2], (1, HIDDEN), jnp.float32),
        "w2": (scale * jax.random.normal(ks[3], (HIDDEN, HIDDEN), jnp.float32)).astype(jnp.bfloat16),
        "b2": scale * jax.random.normal(ks[4], (1, HIDDEN), jnp.float32),
        "w3": (scale * jax.random.normal(ks[5], (HIDDEN, HIDDEN), jnp.float32)).astype(jnp.bfloat16),
        "b3": scale * jax.random.normal(ks[6], (1, HIDDEN), jnp.float32),
        "w4": (scale * jax.random.normal(ks[7], (HIDDEN, 1), jnp.float32)).astype(jnp.bfloat16),
        "b4": scale * jax.random.normal(ks[8], (1, 1), jnp.float32),
    }


def reference_forward(img, labels, params):
    """Pure-JAX f32 reference using the same (bf16-rounded) weights."""
    B = img.shape[0]
    flat = img.reshape(B, IMG_FEATURES).astype(jnp.float32)
    emb = params["emb"][labels].astype(jnp.float32)
    h = (flat @ params["w1_img"].astype(jnp.float32)
         + emb @ params["w1_lab"].astype(jnp.float32) + params["b1"])
    h = jnp.where(h > 0, h, 0.2 * h)
    h = h @ params["w2"].astype(jnp.float32) + params["b2"]
    h = jnp.where(h > 0, h, 0.2 * h)
    h = h @ params["w3"].astype(jnp.float32) + params["b3"]
    h = jnp.where(h > 0, h, 0.2 * h)
    logits = h @ params["w4"].astype(jnp.float32) + params["b4"]
    return jax.nn.sigmoid(logits)


if __name__ == "__main__":
    key = jax.random.PRNGKey(0)
    k_img, k_lab, k_par = jax.random.split(key, 3)

    B = 16
    img = jax.random.normal(k_img, (B, *INPUT_SIZE), jnp.float32)   # (16, 1, 28, 28)
    labels = jax.random.randint(k_lab, (B,), 0, NUM_CLASSES, jnp.int32)
    params = init_params(k_par)

    out = discriminator_forward(img, labels, params)
    out = jax.block_until_ready(out)

    ref = reference_forward(img, labels, params)
    assert out.shape == (B, 1), out.shape
    assert jnp.allclose(out, ref, atol=1e-2, rtol=1e-2), (out, ref)
    print("KERNEL_OK")
</pallas_src>

<mosaic_0001>
module attributes {stable_mosaic.version = 11 : i64} {
  func.func @disc_kernel(%arg0: i32, %arg1: memref<8x784xf32, #tpu.memory_space<vmem>>, %arg2: memref<8x10xf32, #tpu.memory_space<vmem>>, %arg3: memref<784x512xbf16, #tpu.memory_space<vmem>>, %arg4: memref<10x512xbf16, #tpu.memory_space<vmem>>, %arg5: memref<1x512xf32, #tpu.memory_space<vmem>>, %arg6: memref<512x512xbf16, #tpu.memory_space<vmem>>, %arg7: memref<1x512xf32, #tpu.memory_space<vmem>>, %arg8: memref<512x512xbf16, #tpu.memory_space<vmem>>, %arg9: memref<1x512xf32, #tpu.memory_space<vmem>>, %arg10: memref<512x1xbf16, #tpu.memory_space<vmem>>, %arg11: memref<1x1xf32, #tpu.memory_space<vmem>>, %arg12: memref<8x1xf32, #tpu.memory_space<vmem>>) attributes {dimension_semantics = [#tpu.dimension_semantics<parallel>], iteration_bounds = array<i64: 2>, scalar_prefetch = 0 : i64, scratch_operands = 0 : i64, tpu.core_type = #tpu.core_type<tc>, window_params = [{transform_indices = @transform_0, window_bounds = array<i64: 8, 784>}, {transform_indices = @transform_1, window_bounds = array<i64: 8, 10>}, {pipeline_mode = #tpu.pipeline_mode<synchronous>, transform_indices = @transform_2, window_bounds = array<i64: 784, 512>}, {pipeline_mode = #tpu.pipeline_mode<synchronous>, transform_indices = @transform_3, window_bounds = array<i64: 10, 512>}, {pipeline_mode = #tpu.pipeline_mode<synchronous>, transform_indices = @transform_4, window_bounds = array<i64: 1, 512>}, {pipeline_mode = #tpu.pipeline_mode<synchronous>, transform_indices = @transform_5, window_bounds = array<i64: 512, 512>}, {pipeline_mode = #tpu.pipeline_mode<synchronous>, transform_indices = @transform_6, window_bounds = array<i64: 1, 512>}, {pipeline_mode = #tpu.pipeline_mode<synchronous>, transform_indices = @transform_7, window_bounds = array<i64: 512, 512>}, {pipeline_mode = #tpu.pipeline_mode<synchronous>, transform_indices = @transform_8, window_bounds = array<i64: 1, 512>}, {pipeline_mode = #tpu.pipeline_mode<synchronous>, transform_indices = @transform_9, window_bounds = array<i64: 512, 1>}, {pipeline_mode = #tpu.pipeline_mode<synchronous>, transform_indices = @transform_10, window_bounds = array<i64: 1, 1>}, {transform_indices = @transform_11, window_bounds = array<i64: 8, 1>}]} {
    %c0 = arith.constant 0 : index
    %c0_0 = arith.constant 0 : index
    %0 = vector.load %arg1[%c0, %c0_0] : memref<8x784xf32, #tpu.memory_space<vmem>>, vector<8x784xf32>
    %1 = arith.truncf %0 : vector<8x784xf32> to vector<8x784xbf16>
    %c0_1 = arith.constant 0 : index
    %c0_2 = arith.constant 0 : index
    %2 = vector.load %arg2[%c0_1, %c0_2] : memref<8x10xf32, #tpu.memory_space<vmem>>, vector<8x10xf32>
    %3 = arith.truncf %2 : vector<8x10xf32> to vector<8x10xbf16>
    %c0_3 = arith.constant 0 : index
    %c0_4 = arith.constant 0 : index
    %4 = vector.load %arg3[%c0_3, %c0_4] : memref<784x512xbf16, #tpu.memory_space<vmem>>, vector<784x512xbf16>
    %cst = arith.constant dense<0.000000e+00> : vector<8x512xf32>
    %5 = tpu.matmul %1, %4, %cst {dimension_numbers = #tpu.dot_dimension_numbers<[1], [0], [0], [1], [0, 0, 1, 1], [], []>} : vector<8x784xbf16>, vector<784x512xbf16>, vector<8x512xf32> -> vector<8x512xf32>
    %c0_5 = arith.constant 0 : index
    %c0_6 = arith.constant 0 : index
    %6 = vector.load %arg4[%c0_5, %c0_6] : memref<10x512xbf16, #tpu.memory_space<vmem>>, vector<10x512xbf16>
    %cst_7 = arith.constant dense<0.000000e+00> : vector<8x512xf32>
    %7 = tpu.matmul %3, %6, %cst_7 {dimension_numbers = #tpu.dot_dimension_numbers<[1], [0], [0], [1], [0, 0, 1, 1], [], []>} : vector<8x10xbf16>, vector<10x512xbf16>, vector<8x512xf32> -> vector<8x512xf32>
    %8 = arith.addf %5, %7 : vector<8x512xf32>
    %c0_8 = arith.constant 0 : index
    %c0_9 = arith.constant 0 : index
    %9 = vector.load %arg5[%c0_8, %c0_9] : memref<1x512xf32, #tpu.memory_space<vmem>>, vector<1x512xf32>
    %10 = vector.broadcast %9 : vector<1x512xf32> to vector<8x512xf32>
    %11 = arith.addf %8, %10 : vector<8x512xf32>
    %cst_10 = arith.constant 0.000000e+00 : f32
    %12 = vector.broadcast %cst_10 : f32 to vector<8x512xf32>
    %13 = arith.cmpf ogt, %11, %12 : vector<8x512xf32>
    %cst_11 = arith.constant 2.000000e-01 : f32
    %14 = vector.broadcast %cst_11 : f32 to vector<8x512xf32>
    %15 = arith.mulf %14, %11 : vector<8x512xf32>
    %16 = arith.select %13, %11, %15 : vector<8x512xi1>, vector<8x512xf32>
    %17 = arith.truncf %16 : vector<8x512xf32> to vector<8x512xbf16>
    %c0_12 = arith.constant 0 : index
    %c0_13 = arith.constant 0 : index
    %18 = vector.load %arg6[%c0_12, %c0_13] : memref<512x512xbf16, #tpu.memory_space<vmem>>, vector<512x512xbf16>
    %cst_14 = arith.constant dense<0.000000e+00> : vector<8x512xf32>
    %19 = tpu.matmul %17, %18, %cst_14 {dimension_numbers = #tpu.dot_dimension_numbers<[1], [0], [0], [1], [0, 0, 1, 1], [], []>} : vector<8x512xbf16>, vector<512x512xbf16>, vector<8x512xf32> -> vector<8x512xf32>
    %c0_15 = arith.constant 0 : index
    %c0_16 = arith.constant 0 : index
    %20 = vector.load %arg7[%c0_15, %c0_16] : memref<1x512xf32, #tpu.memory_space<vmem>>, vector<1x512xf32>
    %21 = vector.broadcast %20 : vector<1x512xf32> to vector<8x512xf32>
    %22 = arith.addf %19, %21 : vector<8x512xf32>
    %cst_17 = arith.constant 0.000000e+00 : f32
    %23 = vector.broadcast %cst_17 : f32 to vector<8x512xf32>
    %24 = arith.cmpf ogt, %22, %23 : vector<8x512xf32>
    %cst_18 = arith.constant 2.000000e-01 : f32
    %25 = vector.broadcast %cst_18 : f32 to vector<8x512xf32>
    %26 = arith.mulf %25, %22 : vector<8x512xf32>
    %27 = arith.select %24, %22, %26 : vector<8x512xi1>, vector<8x512xf32>
    %28 = arith.truncf %27 : vector<8x512xf32> to vector<8x512xbf16>
    %c0_19 = arith.constant 0 : index
    %c0_20 = arith.constant 0 : index
    %29 = vector.load %arg8[%c0_19, %c0_20] : memref<512x512xbf16, #tpu.memory_space<vmem>>, vector<512x512xbf16>
    %cst_21 = arith.constant dense<0.000000e+00> : vector<8x512xf32>
    %30 = tpu.matmul %28, %29, %cst_21 {dimension_numbers = #tpu.dot_dimension_numbers<[1], [0], [0], [1], [0, 0, 1, 1], [], []>} : vector<8x512xbf16>, vector<512x512xbf16>, vector<8x512xf32> -> vector<8x512xf32>
    %c0_22 = arith.constant 0 : index
    %c0_23 = arith.constant 0 : index
    %31 = vector.load %arg9[%c0_22, %c0_23] : memref<1x512xf32, #tpu.memory_space<vmem>>, vector<1x512xf32>
    %32 = vector.broadcast %31 : vector<1x512xf32> to vector<8x512xf32>
    %33 = arith.addf %30, %32 : vector<8x512xf32>
    %cst_24 = arith.constant 0.000000e+00 : f32
    %34 = vector.broadcast %cst_24 : f32 to vector<8x512xf32>
    %35 = arith.cmpf ogt, %33, %34 : vector<8x512xf32>
    %cst_25 = arith.constant 2.000000e-01 : f32
    %36 = vector.broadcast %cst_25 : f32 to vector<8x512xf32>
    %37 = arith.mulf %36, %33 : vector<8x512xf32>
    %38 = arith.select %35, %33, %37 : vector<8x512xi1>, vector<8x512xf32>
    %39 = arith.truncf %38 : vector<8x512xf32> to vector<8x512xbf16>
    %c0_26 = arith.constant 0 : index
    %c0_27 = arith.constant 0 : index
    %40 = vector.load %arg10[%c0_26, %c0_27] : memref<512x1xbf16, #tpu.memory_space<vmem>>, vector<512x1xbf16>
    %cst_28 = arith.constant dense<0.000000e+00> : vector<8x1xf32>
    %41 = tpu.matmul %39, %40, %cst_28 {dimension_numbers = #tpu.dot_dimension_numbers<[1], [0], [0], [1], [0, 0, 1, 1], [], []>} : vector<8x512xbf16>, vector<512x1xbf16>, vector<8x1xf32> -> vector<8x1xf32>
    %c0_29 = arith.constant 0 : index
    %c0_30 = arith.constant 0 : index
    %42 = vector.load %arg11[%c0_29, %c0_30] : memref<1x1xf32, #tpu.memory_space<vmem>>, vector<1x1xf32>
    %43 = vector.broadcast %42 : vector<1x1xf32> to vector<8x1xf32>
    %44 = arith.addf %41, %43 : vector<8x1xf32>
    %cst_31 = arith.constant 0.000000e+00 : f32
    %45 = vector.broadcast %cst_31 : f32 to vector<8x1xf32>
    %46 = arith.subf %45, %44 : vector<8x1xf32>
    %47 = math.exp %46 : vector<8x1xf32>
    %cst_32 = arith.constant 1.000000e+00 : f32
    %48 = vector.broadcast %cst_32 : f32 to vector<8x1xf32>
    %49 = arith.addf %48, %47 : vector<8x1xf32>
    %50 = tpu.reciprocal %49 {approx = true} : vector<8x1xf32> -> vector<8x1xf32>
    %c0_33 = arith.constant 0 : index
    %c0_34 = arith.constant 0 : index
    %51 = vector.load %arg12[%c0_33, %c0_34] : memref<8x1xf32, #tpu.memory_space<vmem>>, vector<8x1xf32>
    tpu.vector_store %arg12[%c0_33, %c0_34], %50 {strides = array<i32>} : memref<8x1xf32, #tpu.memory_space<vmem>>, vector<8x1xf32>,
    return
  }
  func.func @transform_0(%arg0: i32) -> (i32, i32) {
    %c0_i32 = arith.constant 0 : i32
    %c0_i32_0 = arith.constant 0 : i32
    return %arg0, %c0_i32 : i32, i32
  }
  func.func @transform_1(%arg0: i32) -> (i32, i32) {
    %c0_i32 = arith.constant 0 : i32
    %c0_i32_0 = arith.constant 0 : i32
    return %arg0, %c0_i32 : i32, i32
  }
  func.func @transform_2(%arg0: i32) -> (i32, i32) {
    %c0_i32 = arith.constant 0 : i32
    %c0_i32_0 = arith.constant 0 : i32
    %c0_i32_1 = arith.constant 0 : i32
    return %c0_i32, %c0_i32_0 : i32, i32
  }
  func.func @transform_3(%arg0: i32) -> (i32, i32) {
    %c0_i32 = arith.constant 0 : i32
    %c0_i32_0 = arith.constant 0 : i32
    %c0_i32_1 = arith.constant 0 : i32
    return %c0_i32, %c0_i32_0 : i32, i32
  }
  func.func @transform_4(%arg0: i32) -> (i32, i32) {
    %c0_i32 = arith.constant 0 : i32
    %c0_i32_0 = arith.constant 0 : i32
    %c0_i32_1 = arith.constant 0 : i32
    return %c0_i32, %c0_i32_0 : i32, i32
  }
  func.func @transform_5(%arg0: i32) -> (i32, i32) {
    %c0_i32 = arith.constant 0 : i32
    %c0_i32_0 = arith.constant 0 : i32
    %c0_i32_1 = arith.constant 0 : i32
    return %c0_i32, %c0_i32_0 : i32, i32
  }
  func.func @transform_6(%arg0: i32) -> (i32, i32) {
    %c0_i32 = arith.constant 0 : i32
    %c0_i32_0 = arith.constant 0 : i32
    %c0_i32_1 = arith.constant 0 : i32
    return %c0_i32, %c0_i32_0 : i32, i32
  }
  func.func @transform_7(%arg0: i32) -> (i32, i32) {
    %c0_i32 = arith.constant 0 : i32
    %c0_i32_0 = arith.constant 0 : i32
    %c0_i32_1 = arith.constant 0 : i32
    return %c0_i32, %c0_i32_0 : i32, i32
  }
  func.func @transform_8(%arg0: i32) -> (i32, i32) {
    %c0_i32 = arith.constant 0 : i32
    %c0_i32_0 = arith.constant 0 : i32
    %c0_i32_1 = arith.constant 0 : i32
    return %c0_i32, %c0_i32_0 : i32, i32
  }
  func.func @transform_9(%arg0: i32) -> (i32, i32) {
    %c0_i32 = arith.constant 0 : i32
    %c0_i32_0 = arith.constant 0 : i32
    %c0_i32_1 = arith.constant 0 : i32
    return %c0_i32, %c0_i32_0 : i32, i32
  }
  func.func @transform_10(%arg0: i32) -> (i32, i32) {
    %c0_i32 = arith.constant 0 : i32
    %c0_i32_0 = arith.constant 0 : i32
    %c0_i32_1 = arith.constant 0 : i32
    return %c0_i32, %c0_i32_0 : i32, i32
  }
  func.func @transform_11(%arg0: i32) -> (i32, i32) {
    %c0_i32 = arith.constant 0 : i32
    %c0_i32_0 = arith.constant 0 : i32
    return %arg0, %c0_i32 : i32, i32
  }
}

</mosaic_0001>

<bundles_post_ra>
// kernel: discriminator_forward.1
= control target key start
LH: loop header
LB: loop body
LE: loop exit
PB: predicated region body
PF: predicated region fallthrough
CT: control target
= control target key end

     0   :  { %s6878_s0 = inlined_call_operand.vmem [shape: f32[16,784], index: 0, kind: input, shape index: {}]   ;;  %s6879_s1 = inlined_call_operand.vmem [shape: f32[16,10], index: 1, kind: input, shape index: {}]   ;;  %s6880_s2 = inlined_call_operand.vmem [shape: bf16[784,512], index: 2, kind: input, shape index: {}]   ;;  %s6881_s3 = inlined_call_operand.vmem [shape: bf16[10,512], index: 3, kind: input, shape index: {}]   ;;  %s6882_s4 = inlined_call_operand.vmem [shape: f32[1,512], index: 4, kind: input, shape index: {}]   ;;  %s6883_s5 = inlined_call_operand.hbm [shape: bf16[512,512], index: 5, kind: input, shape index: {}]   ;;  %s6884_s6 = inlined_call_operand.vmem [shape: f32[1,512], index: 6, kind: input, shape index: {}]   ;;  %s6885_s7 = inlined_call_operand.hbm [shape: bf16[512,512], index: 7, kind: input, shape index: {}]   ;;  %s6886_s8 = inlined_call_operand.vmem [shape: f32[1,512], index: 8, kind: input, shape index: {}]   ;;  %s6887_s9 = inlined_call_operand.vmem [shape: bf16[512,1], index: 9, kind: input, shape index: {}]   ;;  %s6888_s10 = inlined_call_operand.<no memory space> [shape: f32[1,1], index: 10, kind: input, shape index: {}]   ;;  %s6889_s11 = inlined_call_operand.vmem [shape: f32[16,1], index: 11, kind: output, shape index: {}]  }
   0x1   :  { %v16_v0 = vstv %s6888_s10 }
   0x2   :  { %17 = vst [vmem:[#allocation2] sm:$0x1] %v16_v0 }
   0x3   :  { %18 = vsyncpa [#allocation4], 0 }
   0x4   :  { %19 = vsyncpa [#allocation6], 0  ;;  %s5967_s19 = smov 0  }
   0x5 LB: > { %s5973_s20 = sadd.s32 4294967295, %s5897_s19   ;;  %p4499_p0 = scmp.ge.s32.totalorder %s5897_s19, 1  ;;  %s5897_s19 = sphi %s5967_s19, %s25_s19  }
   0x6   : > { %p297_p1 = scmp.lt.s32.totalorder %s5897_s19, 3  ;;  %s5899_s10 = smov [#allocation3]  }
   0x7   : > { %s318_s21 = sshll.u32 %s5899_s10, 4  ;;  %p6890_p3 = scmp.eq.s32.totalorder %s5973_s20, 0  ;;  %s319_s21 = int_to_ptr.vmem [resolvable:$true] %s318_s21 }
   0x8   : > { %p5977_p2 = pnand %p4499_p0, %p297_p1  ;;  %s5900_s23 = smov [#allocation5]  }
   0x9   : > { %s334_s24 = sshll.u32 %s5900_s23, 4  ;;  %s5827_s28 = scalar_lea.hbm %s6883_s5, 16384  ;;  %s5990_s24 = int_to_ptr.vmem [resolvable:$true] %s334_s24 }
   0xa   : > { %s6892_s22 = scalar_select %p5977_p2, 1, 0 }
   0xb   : > { %p5083_p4 = pneg %p5977_p2  ;;  %p5828_p6 = scmp.ne.s32.totalorder %s6883_s5, %s5827_s28 }
   0xc   : > { %p5834_p10 = scmp.lt.u32.totalorder %s5827_s28, %s6883_s5 }
   0xd   : > { %p5986_p5 = pnand %p6890_p3, %p5083_p4 }
   0xf   : > { %p5829_p7 = pneg %p5986_p5 }
  0x11   : > { %p5830_p8 = pnand %p5829_p7, %p5828_p6 }
  0x13   : > { %p5831_p9 = pneg %p5830_p8 }
  0x15   : > { %p5836_p11 = pnand %p5834_p10, %p5831_p9 }
  0x17   : > { %5839 = shalt.err (!%p5836_p11)
}
  0x18   : > { %s5840_s14 = scalar_lea.vmem %s319_s21, 16384  ;;  %p5848_p1 = scmp.lt.s32.totalorder %s319_s21, %s319_s21 }
  0x19   : > { %p5841_p12 = scmp.ne.s32.totalorder %s319_s21, %s5840_s14  ;;  %p5849_p4 = scmp.lt.s32.totalorder %s5840_s14, %s5840_s14 }
  0x1b   : > { %p5843_p13 = pnand %p5841_p12, %p5829_p7  ;;  %p5850_p3 = por %p5849_p4, %p5848_p1 }
  0x1d   : > { %p5844_p0 = pneg %p5843_p13 }
  0x1f   : > { %p5851_p2 = pnand %p5850_p3, %p5844_p0 }
  0x21   : > { %5854 = shalt.err (!%p5851_p2)
}
  0x22   : > { %s5901_s15 = smov 256   ;;  %s5902_s16 = smov 16  }
  0x23   : > { %5086 = dma.hbm_to_vmem [thread:$0]  (!%p5986_p5), %s6883_s5, 16384, %s319_s21, [#allocation4], %s5901_s15, %s5901_s15, %s5902_s16  }
  0x24   : > { %s5855_s26 = scalar_lea.hbm %s6885_s7, 16384 }
  0x25   : > { %p5856_p6 = scmp.ne.s32.totalorder %s6885_s7, %s5855_s26  ;;  %p5862_p8 = scmp.lt.u32.totalorder %s5855_s26, %s6885_s7 }
  0x27   : > { %p5858_p2 = pnand %p5856_p6, %p5829_p7 }
  0x29   : > { %p5859_p3 = pneg %p5858_p2 }
  0x2b   : > { %p5864_p9 = pnand %p5862_p8, %p5859_p3 }
  0x2d   : > { %5867 = shalt.err (!%p5864_p9)
}
  0x2e   : > { %s5868_s21 = scalar_lea.vmem %s5990_s24, 16384  ;;  %p5876_p13 = scmp.lt.s32.totalorder %s5990_s24, %s5990_s24 }
  0x2f   : > { %p5869_p10 = scmp.ne.s32.totalorder %s5990_s24, %s5868_s21  ;;  %p5877_p0 = scmp.lt.s32.totalorder %s5868_s21, %s5868_s21 }
  0x31   : > { %p5871_p11 = pnand %p5869_p10, %p5829_p7  ;;  %p5878_p1 = por %p5877_p0, %p5876_p13 }
  0x33   : > { %p5872_p12 = pneg %p5871_p11 }
  0x35   : > { %p5879_p4 = pnand %p5878_p1, %p5872_p12 }
  0x37   : > { %5882 = shalt.err (!%p5879_p4)
}
  0x38   : > { %5089 = dma.hbm_to_vmem [thread:$0]  (!%p5986_p5), %s6885_s7, 16384, %s5990_s24, [#allocation6], %s5901_s15, %s5901_s15, %s5902_s16  }
  0x39   : > { %p6894_p6 = scmp.ne.s32.totalorder %s6892_s22, 0 }
  0x3a   : > { %p6895_p2 = scmp.eq.s32.totalorder (!%p6894_p6), %s5973_s20, 0 }
  0x3b   : > { %374 = sbr.rel (%p6894_p6) target bundleno = 1258 (0x4ea), region = 64 }
  0x42   : > { %5888 = dma.done.wait (%p6895_p2), [#allocation4], 16384   ;;  %p6896_p7 = pmov %p6895_p2 }
  0x43   : > { %p6897_p3 = pmov %p6895_p2 }
  0x44   : > { %5890 = vsyncadd (%p6896_p7), [#allocation4], 4294950912 }
  0x45   : > { %5892 = dma.done.wait (%p6897_p3), [#allocation6], 16384   ;;  %p6898_p8 = pmov %p6895_p2 }
  0x46   : > { %p421_p9 = scmp.lt.s32.totalorder %s5973_s20, 1  ;;  %v5903_v1 = vmov 0   ;;  %vm671_vm0 = vcmask 1044480   ;;  %v5107_v2 = vld [vmem:[%s6881_s3 + $0x4] ss:$16 sps:$4 sm:$0x1f]  }
  0x47   : > { %5894 = vsyncadd (%p6898_p8), [#allocation6], 4294950912  ;;  %716 = vmatprep.mubr.bf16.mxu0 %v5903_v1  ;;  %757 = vmatprep.mubr.bf16.mxu1 %v5903_v1  ;;  %v5109_v3 = vld [vmem:[%s6881_s3 + $0xc] ss:$16 sps:$4 sm:$0x1f]   ;;  %vm667_vm1 = vcmask 80896  }
  0x48   : > { %s6900_s20 = smov (!%p421_p9, %s5973_s20), 1  ;;  %4513 = vmatprep.subr.msk.bf16.mxu0 %vm671_vm0, %v5107_v2  ;;  %v5111_v4 = vld [vmem:[%s6881_s3] ss:$16 sps:$4 sm:$0x1f]   ;;  %4515 = vmatprep.subr.msk.bf16.mxu1 %vm671_vm0, %v5109_v3  ;;  %v5115_v11 = vld [vmem:[%s6880_s2 + $0x4] ss:$16 sps:$4 sm:$0xff]  }
  0x49   : > { %s4507_s22 = sshll.u32 %s6900_s20, 3  ;;  %v5112_v5 = vld [vmem:[%s6881_s3 + $0x8] ss:$16 sps:$4 sm:$0x1f]   ;;  %v673_v7 = vsel %vm671_vm0, %v5111_v4, 0  ;;  %s5074_s24 = smul.u32 56, %s6900_s20 }
  0x4a   : > { %s429_s16 = scalar_lea.vmem %s6879_s1, %s4507_s22  ;;  %v679_v8 = vsel %vm671_vm0, %v5112_v5, 0  ;;  %v5113_v10 = vld [vmem:[%s6880_s2] ss:$16 sps:$4 sm:$0xff]   ;;  %685 = vmatpush1.bf16.msra.mxu0 %v673_v7  ;;  %v5118_v13 = vld [vmem:[%s6880_s2 + $0x204] ss:$16 sps:$4 sm:$0xff]   ;;  %vm1746_vm2 = vcmask 130048   ;;  %s433_s30 = scalar_lea.vmem %s6889_s11, %s4507_s22 }
  0x4b   : > { %v449_v6 = vld [vmem:[%s429_s16] sm:$0xff]  ;;  %726 = vmatpush1.bf16.msra.mxu1 %v679_v8  ;;  %1750 = vmatprep.subr.bf16.mxu0 %v5115_v11  ;;  %s6200_s28 = scalar_lea.vmem %s6878_s0, %s5074_s24  ;;  %vm4408_vm15 = vcmask 7168  }
  0x4c   : > { %v450_v9 = vpack.c.bf16 %v449_v6, %v449_v6  ;;  %v5116_v12 = vld [vmem:[%s6880_s2 + $0x200] ss:$16 sps:$4 sm:$0xff]   ;;  %v5121_v14 = vld [vmem:[%s6880_s2 + $0x24] ss:$16 sps:$4 sm:$0xff]   ;;  %1791 = vmatprep.subr.bf16.mxu1 %v5118_v13  ;;  %v436_v55 = vld [vmem:[%s6200_s28 + $0x8] sm:$0xff] }
  0x4d   : > { %v5119_v15 = vld [vmem:[%s6880_s2 + $0x20] ss:$16 sps:$4 sm:$0xff]   ;;  %v5124_v16 = vld [vmem:[%s6880_s2 + $0x224] ss:$16 sps:$4 sm:$0xff]   ;;  %v438_v56 = vld [vmem:[%s6200_s28 + $0x18] sm:$0xff]  ;;  %v6219_v58 = vpack.c.bf16 %v436_v55, %v436_v55 }
  0x4e   : > { %4514 = vmatmul.mubr.msk.bf16.vlgmr.msra.gmra.mrb[0].mxu0 %vm667_vm1, %v450_v9  ;;  %4516 = vmatmul.mubr.msk.bf16.vlgmr.msra.gmra.mrb[0].mxu1 %vm667_vm1, %v450_v9  ;;  %v5122_v17 = vld [vmem:[%s6880_s2 + $0x220] ss:$16 sps:$4 sm:$0xff]   ;;  %v5127_v18 = vld [vmem:[%s6880_s2 + $0x44] ss:$16 sps:$4 sm:$0xff]   ;;  %v6221_v59 = vpack.c.bf16 %v438_v56, %v438_v56  ;;  %v5254_v55 = vld [vmem:[%s6880_s2 + $0xc8] ss:$16 sps:$4 sm:$0xff]  }
  0x4f   : > { %1751 = vmatpush1.bf16.msra.mxu0 %v5113_v10  ;;  %1792 = vmatpush1.bf16.msra.mxu1 %v5116_v12  ;;  %v5130_v19 = vld [vmem:[%s6880_s2 + $0x244] ss:$16 sps:$4 sm:$0xff]   ;;  %v5125_v20 = vld [vmem:[%s6880_s2 + $0x40] ss:$16 sps:$4 sm:$0xff]  }
  0x50   : > { %1752 = vmatprep.subr.bf16.mxu0 %v5121_v14  ;;  %1793 = vmatprep.subr.bf16.mxu1 %v5124_v16  ;;  %v5128_v21 = vld [vmem:[%s6880_s2 + $0x240] ss:$16 sps:$4 sm:$0xff]   ;;  %v5133_v22 = vld [vmem:[%s6880_s2 + $0x64] ss:$16 sps:$4 sm:$0xff]  }
  0x51   : > { %v5136_v23 = vld [vmem:[%s6880_s2 + $0x264] ss:$16 sps:$4 sm:$0xff]   ;;  %v5131_v24 = vld [vmem:[%s6880_s2 + $0x60] ss:$16 sps:$4 sm:$0xff]   ;;  %1782 = vmatprep.mubr.bf16.mxu0 %v6219_v58  ;;  %1823 = vmatprep.mubr.bf16.mxu1 %v6221_v59 }
  0x52   : > { %v5134_v25 = vld [vmem:[%s6880_s2 + $0x260] ss:$16 sps:$4 sm:$0xff]   ;;  %v5139_v26 = vld [vmem:[%s6880_s2 + $0x84] ss:$16 sps:$4 sm:$0xff]  }
  0x53   : > { %1753 = vmatpush1.bf16.msra.mxu0 %v5119_v15  ;;  %1794 = vmatpush1.bf16.msra.mxu1 %v5122_v17  ;;  %v5142_v27 = vld [vmem:[%s6880_s2 + $0x284] ss:$16 sps:$4 sm:$0xff]   ;;  %v5137_v28 = vld [vmem:[%s6880_s2 + $0x80] ss:$16 sps:$4 sm:$0xff]  }
  0x54   : > { %1754 = vmatprep.subr.bf16.mxu0 %v5127_v18  ;;  %1795 = vmatprep.subr.bf16.mxu1 %v5130_v19  ;;  %v5140_v29 = vld [vmem:[%s6880_s2 + $0x280] ss:$16 sps:$4 sm:$0xff]   ;;  %v5145_v30 = vld [vmem:[%s6880_s2 + $0xa4] ss:$16 sps:$4 sm:$0xff]  }
  0x55   : > { %v5148_v31 = vld [vmem:[%s6880_s2 + $0x2a4] ss:$16 sps:$4 sm:$0xff]   ;;  %v5143_v32 = vld [vmem:[%s6880_s2 + $0xa0] ss:$16 sps:$4 sm:$0xff]  }
  0x56   : > { %v5146_v33 = vld [vmem:[%s6880_s2 + $0x2a0] ss:$16 sps:$4 sm:$0xff]   ;;  %v5151_v34 = vld [vmem:[%s6880_s2 + $0xc4] ss:$16 sps:$4 sm:$0xff]  }
  0x57   : > { %1755 = vmatpush1.bf16.msra.mxu0 %v5125_v20  ;;  %1796 = vmatpush1.bf16.msra.mxu1 %v5128_v21  ;;  %v5154_v35 = vld [vmem:[%s6880_s2 + $0x2c4] ss:$16 sps:$4 sm:$0xff]   ;;  %v5149_v36 = vld [vmem:[%s6880_s2 + $0xc0] ss:$16 sps:$4 sm:$0xff]  }
  0x58   : > { %1756 = vmatprep.subr.bf16.mxu0 %v5133_v22  ;;  %1797 = vmatprep.subr.bf16.mxu1 %v5136_v23  ;;  %v5152_v37 = vld [vmem:[%s6880_s2 + $0x2c0] ss:$16 sps:$4 sm:$0xff]   ;;  %v5157_v38 = vld [vmem:[%s6880_s2 + $0xe4] ss:$16 sps:$4 sm:$0xff]  }
  0x59   : > { %v5160_v39 = vld [vmem:[%s6880_s2 + $0x2e4] ss:$16 sps:$4 sm:$0xff]   ;;  %v5155_v40 = vld [vmem:[%s6880_s2 + $0xe0] ss:$16 sps:$4 sm:$0xff]  }
  0x5a   : > { %v5158_v41 = vld [vmem:[%s6880_s2 + $0x2e0] ss:$16 sps:$4 sm:$0xff]   ;;  %v5163_v42 = vld [vmem:[%s6880_s2 + $0x104] ss:$16 sps:$4 sm:$0xff]  }
  0x5b   : > { %1757 = vmatpush1.bf16.msra.mxu0 %v5131_v24  ;;  %1798 = vmatpush1.bf16.msra.mxu1 %v5134_v25  ;;  %v5166_v43 = vld [vmem:[%s6880_s2 + $0x304] ss:$16 sps:$4 sm:$0xff]   ;;  %v5161_v44 = vld [vmem:[%s6880_s2 + $0x100] ss:$16 sps:$4 sm:$0xff]   ;;  %v5220_v24 = vld [vmem:[%s6880_s2 + $0xc] ss:$16 sps:$4 sm:$0xff]  }
  0x5c   : > { %1758 = vmatprep.subr.bf16.mxu0 %v5139_v26  ;;  %1799 = vmatprep.subr.bf16.mxu1 %v5142_v27  ;;  %v5164_v45 = vld [vmem:[%s6880_s2 + $0x300] ss:$16 sps:$4 sm:$0xff]   ;;  %v5169_v46 = vld [vmem:[%s6880_s2 + $0x124] ss:$16 sps:$4 sm:$0xff]  }
  0x5d   : > { %v5172_v47 = vld [vmem:[%s6880_s2 + $0x324] ss:$16 sps:$4 sm:$0xff]   ;;  %v5167_v48 = vld [vmem:[%s6880_s2 + $0x120] ss:$16 sps:$4 sm:$0xff]  }
  0x5e   : > { %v5170_v49 = vld [vmem:[%s6880_s2 + $0x320] ss:$16 sps:$4 sm:$0xff]   ;;  %v5175_v50 = vld [vmem:[%s6880_s2 + $0x144] ss:$16 sps:$4 sm:$0xff]  }
  0x5f   : > { %1759 = vmatpush1.bf16.msra.mxu0 %v5137_v28  ;;  %1800 = vmatpush1.bf16.msra.mxu1 %v5140_v29  ;;  %v5178_v51 = vld [vmem:[%s6880_s2 + $0x344] ss:$16 sps:$4 sm:$0xff]   ;;  %v5173_v52 = vld [vmem:[%s6880_s2 + $0x140] ss:$16 sps:$4 sm:$0xff]  }
  0x60   : > { %1760 = vmatprep.subr.bf16.mxu0 %v5145_v30  ;;  %1801 = vmatprep.subr.bf16.mxu1 %v5148_v31  ;;  %v5176_v53 = vld [vmem:[%s6880_s2 + $0x340] ss:$16 sps:$4 sm:$0xff]   ;;  %v5181_v54 = vld [vmem:[%s6880_s2 + $0x164] ss:$16 sps:$4 sm:$0xff]   ;;  %v5218_v30 = vld [vmem:[%s6880_s2 + $0x8] ss:$16 sps:$4 sm:$0xff]  }
  0x61   : > { %v5184_v57 = vld [vmem:[%s6880_s2 + $0x364] ss:$16 sps:$4 sm:$0xff]   ;;  %v5179_v60 = vld [vmem:[%s6880_s2 + $0x160] ss:$16 sps:$4 sm:$0xff]  }
  0x62   : > { %v5182_v61 = vld [vmem:[%s6880_s2 + $0x360] ss:$16 sps:$4 sm:$0xff]   ;;  %v5187_v62 = vld [vmem:[%s6880_s2 + $0x184] ss:$16 sps:$4 sm:$0xff]  }
  0x63   : > { %1761 = vmatpush1.bf16.msra.mxu0 %v5143_v32  ;;  %1802 = vmatpush1.bf16.msra.mxu1 %v5146_v33  ;;  %v5190_v63 = vld [vmem:[%s6880_s2 + $0x384] ss:$16 sps:$4 sm:$0xff]   ;;  %v5185_v0 = vld [vmem:[%s6880_s2 + $0x180] ss:$16 sps:$4 sm:$0xff]   ;;  %v5226_v32 = vld [vmem:[%s6880_s2 + $0x2c] ss:$16 sps:$4 sm:$0xff]  }
  0x64   : > { %1762 = vmatprep.subr.bf16.mxu0 %v5151_v34  ;;  %1803 = vmatprep.subr.bf16.mxu1 %v5154_v35  ;;  %v5188_v2 = vld [vmem:[%s6880_s2 + $0x380] ss:$16 sps:$4 sm:$0xff]   ;;  %v5193_v3 = vld [vmem:[%s6880_s2 + $0x1a4] ss:$16 sps:$4 sm:$0xff]   ;;  %v5224_v34 = vld [vmem:[%s6880_s2 + $0x28] ss:$16 sps:$4 sm:$0xff]  }
  0x65   : > { %v5196_v4 = vld [vmem:[%s6880_s2 + $0x3a4] ss:$16 sps:$4 sm:$0xff]   ;;  %v5191_v5 = vld [vmem:[%s6880_s2 + $0x1a0] ss:$16 sps:$4 sm:$0xff]  }
  0x66   : > { %v5194_v6 = vld [vmem:[%s6880_s2 + $0x3a0] ss:$16 sps:$4 sm:$0xff]   ;;  %v5199_v7 = vld [vmem:[%s6880_s2 + $0x1c4] ss:$16 sps:$4 sm:$0xff]  }
  0x67   : > { %1763 = vmatpush1.bf16.msra.mxu0 %v5149_v36  ;;  %1804 = vmatpush1.bf16.msra.mxu1 %v5152_v37  ;;  %v5202_v8 = vld [vmem:[%s6880_s2 + $0x3c4] ss:$16 sps:$4 sm:$0xff]   ;;  %v5197_v9 = vld [vmem:[%s6880_s2 + $0x1c0] ss:$16 sps:$4 sm:$0xff]   ;;  %v5232_v36 = vld [vmem:[%s6880_s2 + $0x4c] ss:$16 sps:$4 sm:$0xff]  }
  0x68   : > { %1764 = vmatprep.subr.bf16.mxu0 %v5157_v38  ;;  %1805 = vmatprep.subr.bf16.mxu1 %v5160_v39  ;;  %v5200_v10 = vld [vmem:[%s6880_s2 + $0x3c0] ss:$16 sps:$4 sm:$0xff]   ;;  %v5205_v11 = vld [vmem:[%s6880_s2 + $0x1e4] ss:$16 sps:$4 sm:$0xff]   ;;  %v5230_v38 = vld [vmem:[%s6880_s2 + $0x48] ss:$16 sps:$4 sm:$0xff]  }
  0x69   : > { %v5203_v12 = vld [vmem:[%s6880_s2 + $0x1e0] ss:$16 sps:$4 sm:$0xff]   ;;  %v5208_v13 = vld [vmem:[%s6880_s2 + $0x3e4] ss:$16 sps:$4 sm:$0xff]  }
  0x6a   : > { %v5206_v14 = vld [vmem:[%s6880_s2 + $0x3e0] ss:$16 sps:$4 sm:$0xff]   ;;  %v5211_v17 = vld [vmem:[%s6880_s2 + $0x404] ss:$16 sps:$4 sm:$0xff]  }
  0x6b   : > { %1765 = vmatpush1.bf16.msra.mxu0 %v5155_v40  ;;  %1806 = vmatpush1.bf16.msra.mxu1 %v5158_v41  ;;  %v435_v15 = vld [vmem:[%s6200_s28] sm:$0xff]  ;;  %v437_v16 = vld [vmem:[%s6200_s28 + $0x10] sm:$0xff]  ;;  %v5238_v40 = vld [vmem:[%s6880_s2 + $0x6c] ss:$16 sps:$4 sm:$0xff]  }
  0x6c   : > { %1766 = vmatprep.subr.bf16.mxu0 %v5163_v42  ;;  %1807 = vmatprep.subr.bf16.mxu1 %v5166_v43  ;;  %v5214_v18 = vld [vmem:[%s6880_s2 + $0x604] ss:$16 sps:$4 sm:$0xff]   ;;  %v6287_v19 = vpack.c.bf16 %v435_v15, %v435_v15  ;;  %v6289_v20 = vpack.c.bf16 %v437_v16, %v437_v16  ;;  %v5209_v21 = vld [vmem:[%s6880_s2 + $0x400] ss:$16 sps:$4 sm:$0xff]   ;;  %v440_v42 = vld [vmem:[%s6200_s28 + $0x28] sm:$0xff] }
  0x6d   : > { %v5212_v22 = vld [vmem:[%s6880_s2 + $0x600] ss:$16 sps:$4 sm:$0xff]   ;;  %v5217_v23 = vld [vmem:[%s6880_s2 + $0x424] ss:$16 sps:$4 sm:$0xff]   ;;  %v5236_v43 = vld [vmem:[%s6880_s2 + $0x68] ss:$16 sps:$4 sm:$0xff]  }
  0x6e   : > { %v5215_v25 = vld [vmem:[%s6880_s2 + $0x420] ss:$16 sps:$4 sm:$0xff]   ;;  %v5223_v26 = vld [vmem:[%s6880_s2 + $0x444] ss:$16 sps:$4 sm:$0xff]   ;;  %v5292_v16 = vld [vmem:[%s6880_s2 + $0x18c] ss:$16 sps:$4 sm:$0xff]  }
  0x6f   : > { %1767 = vmatpush1.bf16.msra.mxu0 %v5161_v44  ;;  %1808 = vmatpush1.bf16.msra.mxu1 %v5164_v45  ;;  %v441_v27 = vld [vmem:[%s6200_s28 + $0x30] sm:$0xff]  ;;  %v6364_v45 = vpack.c.bf16 %v440_v42, %v440_v42  ;;  %v5320_v42 = vld [vmem:[%s6880_s2 + $0x428] ss:$16 sps:$4 sm:$0xff]  }
  0x70   : > { %1768 = vmatprep.subr.bf16.mxu0 %v5169_v46  ;;  %1809 = vmatprep.subr.bf16.mxu1 %v5172_v47  ;;  %v5221_v28 = vld [vmem:[%s6880_s2 + $0x440] ss:$16 sps:$4 sm:$0xff]   ;;  %v6316_v29 = vpack.c.bf16 %v441_v27, %v441_v27  ;;  %v5229_v31 = vld [vmem:[%s6880_s2 + $0x464] ss:$16 sps:$4 sm:$0xff]   ;;  %v5244_v46 = vld [vmem:[%s6880_s2 + $0x8c] ss:$16 sps:$4 sm:$0xff]  }
  0x71   : > { %v5227_v33 = vld [vmem:[%s6880_s2 + $0x460] ss:$16 sps:$4 sm:$0xff]   ;;  %v5235_v35 = vld [vmem:[%s6880_s2 + $0x484] ss:$16 sps:$4 sm:$0xff]   ;;  %v5242_v47 = vld [vmem:[%s6880_s2 + $0x88] ss:$16 sps:$4 sm:$0xff]  }
  0x72   : > { %v5233_v37 = vld [vmem:[%s6880_s2 + $0x480] ss:$16 sps:$4 sm:$0xff]   ;;  %v5241_v39 = vld [vmem:[%s6880_s2 + $0x4a4] ss:$16 sps:$4 sm:$0xff]   ;;  %v5304_v27 = vld [vmem:[%s6880_s2 + $0x1cc] ss:$16 sps:$4 sm:$0xff]  }
  0x73   : > { %1769 = vmatpush1.bf16.msra.mxu0 %v5167_v48  ;;  %1810 = vmatpush1.bf16.msra.mxu1 %v5170_v49  ;;  %v5239_v41 = vld [vmem:[%s6880_s2 + $0x4a0] ss:$16 sps:$4 sm:$0xff]   ;;  %v5247_v44 = vld [vmem:[%s6880_s2 + $0x4c4] ss:$16 sps:$4 sm:$0xff]  }
  0x74   : > { %1770 = vmatprep.subr.bf16.mxu0 %v5175_v50  ;;  %1811 = vmatprep.subr.bf16.mxu1 %v5178_v51  ;;  %v5245_v48 = vld [vmem:[%s6880_s2 + $0x4c0] ss:$16 sps:$4 sm:$0xff]   ;;  %v5253_v49 = vld [vmem:[%s6880_s2 + $0x4e4] ss:$16 sps:$4 sm:$0xff]   ;;  %v5250_v50 = vld [vmem:[%s6880_s2 + $0xac] ss:$16 sps:$4 sm:$0xff]  }
  0x75   : > { %v5248_v51 = vld [vmem:[%s6880_s2 + $0xa8] ss:$16 sps:$4 sm:$0xff]   ;;  %v5257_v56 = vld [vmem:[%s6880_s2 + $0x500] ss:$16 sps:$4 sm:$0xff]   ;;  %v5295_v15 = vld [vmem:[%s6880_s2 + $0x5c4] ss:$16 sps:$4 sm:$0xff]  }
  0x77   : > { %1771 = vmatpush1.bf16.msra.mxu0 %v5173_v52  ;;  %1812 = vmatpush1.bf16.msra.mxu1 %v5176_v53  ;;  %v5251_v52 = vld [vmem:[%s6880_s2 + $0x4e0] ss:$16 sps:$4 sm:$0xff]   ;;  %v5259_v53 = vld [vmem:[%s6880_s2 + $0x504] ss:$16 sps:$4 sm:$0xff]  }
  0x78   : > { %1772 = vmatprep.subr.bf16.mxu0 %v5181_v54  ;;  %1813 = vmatprep.subr.bf16.mxu1 %v5184_v57  ;;  %v5256_v54 = vld [vmem:[%s6880_s2 + $0xcc] ss:$16 sps:$4 sm:$0xff]   ;;  %v5265_v57 = vld [vmem:[%s6880_s2 + $0x524] ss:$16 sps:$4 sm:$0xff]  }
  0x7b   : > { %1773 = vmatpush1.bf16.msra.mxu0 %v5179_v60  ;;  %1814 = vmatpush1.bf16.msra.mxu1 %v5182_v61  ;;  %v5260_v60 = vld [vmem:[%s6880_s2 + $0xe8] ss:$16 sps:$4 sm:$0xff]   ;;  %v5263_v61 = vld [vmem:[%s6880_s2 + $0x520] ss:$16 sps:$4 sm:$0xff]  }
  0x7c   : > { %1774 = vmatprep.subr.bf16.mxu0 %v5187_v62  ;;  %1815 = vmatprep.subr.bf16.mxu1 %v5190_v63  ;;  %v5271_v62 = vld [vmem:[%s6880_s2 + $0x544] ss:$16 sps:$4 sm:$0xff]   ;;  %v5268_v63 = vld [vmem:[%s6880_s2 + $0x10c] ss:$16 sps:$4 sm:$0xff]  }
  0x7f   : > { %1775 = vmatpush1.bf16.msra.mxu0 %v5185_v0  ;;  %1816 = vmatpush1.bf16.msra.mxu1 %v5188_v2  ;;  %v5266_v0 = vld [vmem:[%s6880_s2 + $0x108] ss:$16 sps:$4 sm:$0xff]   ;;  %v5269_v2 = vld [vmem:[%s6880_s2 + $0x540] ss:$16 sps:$4 sm:$0xff]  }
  0x80   : > { %1776 = vmatprep.subr.bf16.mxu0 %v5193_v3  ;;  %1817 = vmatprep.subr.bf16.mxu1 %v5196_v4  ;;  %v5277_v3 = vld [vmem:[%s6880_s2 + $0x564] ss:$16 sps:$4 sm:$0xff]   ;;  %v5274_v4 = vld [vmem:[%s6880_s2 + $0x12c] ss:$16 sps:$4 sm:$0xff]  }
  0x83   : > { %1777 = vmatpush1.bf16.msra.mxu0 %v5191_v5  ;;  %1818 = vmatpush1.bf16.msra.mxu1 %v5194_v6  ;;  %v5272_v5 = vld [vmem:[%s6880_s2 + $0x128] ss:$16 sps:$4 sm:$0xff]   ;;  %v5275_v6 = vld [vmem:[%s6880_s2 + $0x560] ss:$16 sps:$4 sm:$0xff]  }
  0x84   : > { %1778 = vmatprep.subr.bf16.mxu0 %v5199_v7  ;;  %1819 = vmatprep.subr.bf16.mxu1 %v5202_v8  ;;  %v5283_v7 = vld [vmem:[%s6880_s2 + $0x584] ss:$16 sps:$4 sm:$0xff]   ;;  %v5280_v8 = vld [vmem:[%s6880_s2 + $0x14c] ss:$16 sps:$4 sm:$0xff]  }
  0x87   : > { %1779 = vmatpush1.bf16.msra.mxu0 %v5197_v9  ;;  %1820 = vmatpush1.bf16.msra.mxu1 %v5200_v10  ;;  %v5278_v9 = vld [vmem:[%s6880_s2 + $0x148] ss:$16 sps:$4 sm:$0xff]   ;;  %v5281_v10 = vld [vmem:[%s6880_s2 + $0x580] ss:$16 sps:$4 sm:$0xff]  }
  0x88   : > { %1780 = vmatprep.subr.bf16.mxu0 %v5205_v11  ;;  %1821 = vmatprep.subr.bf16.mxu1 %v5208_v13  ;;  %v5289_v11 = vld [vmem:[%s6880_s2 + $0x5a4] ss:$16 sps:$4 sm:$0xff]   ;;  %v5284_v13 = vld [vmem:[%s6880_s2 + $0x168] ss:$16 sps:$4 sm:$0xff]  }
  0x8b   : > { %1781 = vmatpush1.bf16.msra.mxu0 %v5203_v12  ;;  %1822 = vmatpush1.bf16.msra.mxu1 %v5206_v14  ;;  %v5286_v12 = vld [vmem:[%s6880_s2 + $0x16c] ss:$16 sps:$4 sm:$0xff]   ;;  %v5287_v14 = vld [vmem:[%s6880_s2 + $0x5a0] ss:$16 sps:$4 sm:$0xff]  }
  0x8c   : > { %1832 = vmatprep.subr.bf16.mxu0 %v5211_v17  ;;  %1873 = vmatprep.subr.bf16.mxu1 %v5214_v18  ;;  %v5290_v17 = vld [vmem:[%s6880_s2 + $0x188] ss:$16 sps:$4 sm:$0xff]   ;;  %v5293_v18 = vld [vmem:[%s6880_s2 + $0x5c0] ss:$16 sps:$4 sm:$0xff]  }
  0x8e   : > { %1783 = vmatmul.mubr.bf16.vlgmr.msra.gmra.mrb[4].mxu0 %v6287_v19  ;;  %1824 = vmatmul.mubr.bf16.vlgmr.msra.gmra.mrb[4].mxu1 %v6289_v20 }
  0x8f   : > { %1833 = vmatpush1.bf16.msra.mxu0 %v5209_v21  ;;  %1874 = vmatpush1.bf16.msra.mxu1 %v5212_v22  ;;  %v5301_v21 = vld [vmem:[%s6880_s2 + $0x5e4] ss:$16 sps:$4 sm:$0xff]   ;;  %v5298_v22 = vld [vmem:[%s6880_s2 + $0x1ac] ss:$16 sps:$4 sm:$0xff]  }
  0x90   : > { %1834 = vmatprep.subr.bf16.mxu0 %v5217_v23  ;;  %1905 = vmatprep.mubr.bf16.mxu1 %v5903_v1  ;;  %v5296_v23 = vld [vmem:[%s6880_s2 + $0x1a8] ss:$16 sps:$4 sm:$0xff]  }
  0x91   : > { %1914 = vmatprep.subr.bf16.mxu1 %v5220_v24  ;;  %1864 = vmatprep.mubr.bf16.mxu0 %v6364_v45  ;;  %v5299_v24 = vld [vmem:[%s6880_s2 + $0x5e0] ss:$16 sps:$4 sm:$0xff]  }
  0x93   : > { %1835 = vmatpush1.bf16.msra.mxu0 %v5215_v25  ;;  %v439_v25 = vld [vmem:[%s6200_s28 + $0x20] sm:$0xff] }
  0x94   : > { %1836 = vmatprep.subr.bf16.mxu0 %v5223_v26  ;;  %v5307_v26 = vld [vmem:[%s6880_s2 + $0x20c] ss:$16 sps:$4 sm:$0xff]  }
  0x96   : > { %4713 = vmatmul.mubr.msk.bf16.vlgmr.msra.gmra.mrb[8].mxu1 %vm1746_vm2, %v6316_v29 }
  0x97   : > { %1837 = vmatpush1.bf16.msra.mxu0 %v5221_v28  ;;  %1915 = vmatpush1.bf16.msra.mxu1 %v5218_v30  ;;  %v6491_v28 = vpack.c.bf16 %v439_v25, %v439_v25  ;;  %v5302_v30 = vld [vmem:[%s6880_s2 + $0x1c8] ss:$16 sps:$4 sm:$0xff]  }
  0x98   : > { %1838 = vmatprep.subr.bf16.mxu0 %v5229_v31  ;;  %1916 = vmatprep.subr.bf16.mxu1 %v5226_v32  ;;  %v5305_v31 = vld [vmem:[%s6880_s2 + $0x208] ss:$16 sps:$4 sm:$0xff]   ;;  %v5313_v32 = vld [vmem:[%s6880_s2 + $0x22c] ss:$16 sps:$4 sm:$0xff]  }
  0x99   : > { %1946 = vmatprep.mubr.bf16.mxu1 %v6219_v58  ;;  %v5262_v58 = vld [vmem:[%s6880_s2 + $0xec] ss:$16 sps:$4 sm:$0xff]   ;;  %v5386_v25 = vld [vmem:[%s6880_s2 + $0x588] ss:$16 sps:$4 sm:$0xff]  }
  0x9b   : > { %1839 = vmatpush1.bf16.msra.mxu0 %v5227_v33  ;;  %1917 = vmatpush1.bf16.msra.mxu1 %v5224_v34  ;;  %v5310_v33 = vld [vmem:[%s6880_s2 + $0x1ec] ss:$16 sps:$4 sm:$0xff]   ;;  %v5308_v34 = vld [vmem:[%s6880_s2 + $0x1e8] ss:$16 sps:$4 sm:$0xff]  }
  0x9c   : > { %1840 = vmatprep.subr.bf16.mxu0 %v5235_v35  ;;  %1918 = vmatprep.subr.bf16.mxu1 %v5232_v36  ;;  %v5311_v35 = vld [vmem:[%s6880_s2 + $0x228] ss:$16 sps:$4 sm:$0xff]   ;;  %v5319_v36 = vld [vmem:[%s6880_s2 + $0x24c] ss:$16 sps:$4 sm:$0xff]  }
  0x9f   : > { %1841 = vmatpush1.bf16.msra.mxu0 %v5233_v37  ;;  %1919 = vmatpush1.bf16.msra.mxu1 %v5230_v38  ;;  %v5316_v37 = vld [vmem:[%s6880_s2 + $0x40c] ss:$16 sps:$4 sm:$0xff]   ;;  %v5317_v38 = vld [vmem:[%s6880_s2 + $0x248] ss:$16 sps:$4 sm:$0xff]  }
  0xa0   : > { %1842 = vmatprep.subr.bf16.mxu0 %v5241_v39  ;;  %1920 = vmatprep.subr.bf16.mxu1 %v5238_v40  ;;  %v5314_v39 = vld [vmem:[%s6880_s2 + $0x408] ss:$16 sps:$4 sm:$0xff]   ;;  %v5325_v40 = vld [vmem:[%s6880_s2 + $0x26c] ss:$16 sps:$4 sm:$0xff]  }
  0xa3   : > { %1843 = vmatpush1.bf16.msra.mxu0 %v5239_v41  ;;  %1921 = vmatpush1.bf16.msra.mxu1 %v5236_v43  ;;  %v5323_v41 = vld [vmem:[%s6880_s2 + $0x268] ss:$16 sps:$4 sm:$0xff]   ;;  %v5331_v43 = vld [vmem:[%s6880_s2 + $0x28c] ss:$16 sps:$4 sm:$0xff]  }
  0xa4   : > { %1844 = vmatprep.subr.bf16.mxu0 %v5247_v44  ;;  %1922 = vmatprep.subr.bf16.mxu1 %v5244_v46  ;;  %v5328_v44 = vld [vmem:[%s6880_s2 + $0x44c] ss:$16 sps:$4 sm:$0xff]   ;;  %v5329_v46 = vld [vmem:[%s6880_s2 + $0x288] ss:$16 sps:$4 sm:$0xff]  }
  0xa7   : > { %1845 = vmatpush1.bf16.msra.mxu0 %v5245_v48  ;;  %1923 = vmatpush1.bf16.msra.mxu1 %v5242_v47  ;;  %v5326_v47 = vld [vmem:[%s6880_s2 + $0x448] ss:$16 sps:$4 sm:$0xff]   ;;  %v5334_v48 = vld [vmem:[%s6880_s2 + $0x46c] ss:$16 sps:$4 sm:$0xff]  }
  0xa8   : > { %1846 = vmatprep.subr.bf16.mxu0 %v5253_v49  ;;  %1924 = vmatprep.subr.bf16.mxu1 %v5250_v50  ;;  %v5332_v49 = vld [vmem:[%s6880_s2 + $0x468] ss:$16 sps:$4 sm:$0xff]   ;;  %v5343_v50 = vld [vmem:[%s6880_s2 + $0x2cc] ss:$16 sps:$4 sm:$0xff]  }
  0xab   : > { %1847 = vmatpush1.bf16.msra.mxu0 %v5251_v52  ;;  %1925 = vmatpush1.bf16.msra.mxu1 %v5248_v51  ;;  %v5340_v51 = vld [vmem:[%s6880_s2 + $0x48c] ss:$16 sps:$4 sm:$0xff]   ;;  %v5341_v52 = vld [vmem:[%s6880_s2 + $0x2c8] ss:$16 sps:$4 sm:$0xff]  }
  0xac   : > { %1848 = vmatprep.subr.bf16.mxu0 %v5259_v53  ;;  %1926 = vmatprep.subr.bf16.mxu1 %v5256_v54  ;;  %v5338_v53 = vld [vmem:[%s6880_s2 + $0x488] ss:$16 sps:$4 sm:$0xff]   ;;  %v5349_v54 = vld [vmem:[%s6880_s2 + $0x2ec] ss:$16 sps:$4 sm:$0xff]  }
  0xaf   : > { %1849 = vmatpush1.bf16.msra.mxu0 %v5257_v56  ;;  %1927 = vmatpush1.bf16.msra.mxu1 %v5254_v55  ;;  %v5346_v55 = vld [vmem:[%s6880_s2 + $0x4ac] ss:$16 sps:$4 sm:$0xff]   ;;  %v5347_v56 = vld [vmem:[%s6880_s2 + $0x2e8] ss:$16 sps:$4 sm:$0xff]  }
  0xb0   : > { %1850 = vmatprep.subr.bf16.mxu0 %v5265_v57  ;;  %1928 = vmatprep.subr.bf16.mxu1 %v5262_v58  ;;  %v5344_v57 = vld [vmem:[%s6880_s2 + $0x4a8] ss:$16 sps:$4 sm:$0xff]   ;;  %v5355_v58 = vld [vmem:[%s6880_s2 + $0x30c] ss:$16 sps:$4 sm:$0xff]  }
  0xb3   : > { %1851 = vmatpush1.bf16.msra.mxu0 %v5263_v61  ;;  %1929 = vmatpush1.bf16.msra.mxu1 %v5260_v60  ;;  %v5352_v60 = vld [vmem:[%s6880_s2 + $0x4cc] ss:$16 sps:$4 sm:$0xff]   ;;  %v5353_v61 = vld [vmem:[%s6880_s2 + $0x308] ss:$16 sps:$4 sm:$0xff]  }
  0xb4   : > { %1852 = vmatprep.subr.bf16.mxu0 %v5271_v62  ;;  %1930 = vmatprep.subr.bf16.mxu1 %v5268_v63  ;;  %v5350_v62 = vld [vmem:[%s6880_s2 + $0x4c8] ss:$16 sps:$4 sm:$0xff]   ;;  %v5361_v63 = vld [vmem:[%s6880_s2 + $0x32c] ss:$16 sps:$4 sm:$0xff]  }
  0xb7   : > { %1853 = vmatpush1.bf16.msra.mxu0 %v5269_v2  ;;  %1931 = vmatpush1.bf16.msra.mxu1 %v5266_v0  ;;  %v5358_v0 = vld [vmem:[%s6880_s2 + $0x4ec] ss:$16 sps:$4 sm:$0xff]   ;;  %v5359_v2 = vld [vmem:[%s6880_s2 + $0x328] ss:$16 sps:$4 sm:$0xff]  }
  0xb8   : > { %1854 = vmatprep.subr.bf16.mxu0 %v5277_v3  ;;  %1932 = vmatprep.subr.bf16.mxu1 %v5274_v4  ;;  %v5356_v3 = vld [vmem:[%s6880_s2 + $0x4e8] ss:$16 sps:$4 sm:$0xff]   ;;  %v5367_v4 = vld [vmem:[%s6880_s2 + $0x34c] ss:$16 sps:$4 sm:$0xff]  }
  0xbb   : > { %1855 = vmatpush1.bf16.msra.mxu0 %v5275_v6  ;;  %1933 = vmatpush1.bf16.msra.mxu1 %v5272_v5  ;;  %v5364_v5 = vld [vmem:[%s6880_s2 + $0x50c] ss:$16 sps:$4 sm:$0xff]   ;;  %v5365_v6 = vld [vmem:[%s6880_s2 + $0x348] ss:$16 sps:$4 sm:$0xff]  }
  0xbc   : > { %1856 = vmatprep.subr.bf16.mxu0 %v5283_v7  ;;  %1934 = vmatprep.subr.bf16.mxu1 %v5280_v8  ;;  %v5362_v7 = vld [vmem:[%s6880_s2 + $0x508] ss:$16 sps:$4 sm:$0xff]   ;;  %v5373_v8 = vld [vmem:[%s6880_s2 + $0x36c] ss:$16 sps:$4 sm:$0xff]  }
  0xbf   : > { %1857 = vmatpush1.bf16.msra.mxu0 %v5281_v10  ;;  %1935 = vmatpush1.bf16.msra.mxu1 %v5278_v9  ;;  %v5370_v9 = vld [vmem:[%s6880_s2 + $0x52c] ss:$16 sps:$4 sm:$0xff]   ;;  %v5371_v10 = vld [vmem:[%s6880_s2 + $0x368] ss:$16 sps:$4 sm:$0xff]  }
  0xc0   : > { %1858 = vmatprep.subr.bf16.mxu0 %v5289_v11  ;;  %1936 = vmatprep.subr.bf16.mxu1 %v5286_v12  ;;  %v5368_v11 = vld [vmem:[%s6880_s2 + $0x528] ss:$16 sps:$4 sm:$0xff]   ;;  %v5379_v12 = vld [vmem:[%s6880_s2 + $0x38c] ss:$16 sps:$4 sm:$0xff]  }
  0xc3   : > { %1859 = vmatpush1.bf16.msra.mxu0 %v5287_v14  ;;  %1937 = vmatpush1.bf16.msra.mxu1 %v5284_v13  ;;  %v5376_v13 = vld [vmem:[%s6880_s2 + $0x54c] ss:$16 sps:$4 sm:$0xff]   ;;  %v5377_v14 = vld [vmem:[%s6880_s2 + $0x388] ss:$16 sps:$4 sm:$0xff]  }
  0xc4   : > { %1860 = vmatprep.subr.bf16.mxu0 %v5295_v15  ;;  %1938 = vmatprep.subr.bf16.mxu1 %v5292_v16  ;;  %v5374_v15 = vld [vmem:[%s6880_s2 + $0x548] ss:$16 sps:$4 sm:$0xff]   ;;  %v5385_v16 = vld [vmem:[%s6880_s2 + $0x3ac] ss:$16 sps:$4 sm:$0xff]  }
  0xc7   : > { %1861 = vmatpush1.bf16.msra.mxu0 %v5293_v18  ;;  %1939 = vmatpush1.bf16.msra.mxu1 %v5290_v17  ;;  %v5382_v17 = vld [vmem:[%s6880_s2 + $0x56c] ss:$16 sps:$4 sm:$0xff]   ;;  %v5383_v18 = vld [vmem:[%s6880_s2 + $0x3a8] ss:$16 sps:$4 sm:$0xff]  }
  0xc8   : > { %1862 = vmatprep.subr.bf16.mxu0 %v5301_v21  ;;  %1940 = vmatprep.subr.bf16.mxu1 %v5298_v22  ;;  %v5380_v21 = vld [vmem:[%s6880_s2 + $0x568] ss:$16 sps:$4 sm:$0xff]   ;;  %v5391_v22 = vld [vmem:[%s6880_s2 + $0x3cc] ss:$16 sps:$4 sm:$0xff]  }
  0xcb   : > { %1863 = vmatpush1.bf16.msra.mxu0 %v5299_v24  ;;  %1941 = vmatpush1.bf16.msra.mxu1 %v5296_v23  ;;  %v5388_v23 = vld [vmem:[%s6880_s2 + $0x58c] ss:$16 sps:$4 sm:$0xff]   ;;  %v5389_v24 = vld [vmem:[%s6880_s2 + $0x3c8] ss:$16 sps:$4 sm:$0xff]  }
  0xcc   : > { %1955 = vmatprep.subr.bf16.mxu0 %v5307_v26  ;;  %1942 = vmatprep.subr.bf16.mxu1 %v5304_v27  ;;  %v5397_v26 = vld [vmem:[%s6880_s2 + $0x3ec] ss:$16 sps:$4 sm:$0xff]  }
  0xcd   : > { %v5394_v27 = vld [vmem:[%s6880_s2 + $0x5ac] ss:$16 sps:$4 sm:$0xff]  }
  0xce   : > { %1865 = vmatmul.mubr.bf16.vlgmr.msra.gmra.mrb[8].mxu0 %v6491_v28 }
  0xcf   : > { %1956 = vmatpush1.bf16.msra.mxu0 %v5305_v31  ;;  %1987 = vmatprep.mubr.bf16.mxu0 %v6221_v59  ;;  %v5322_v59 = vld [vmem:[%s6880_s2 + $0x42c] ss:$16 sps:$4 sm:$0xff]   ;;  %v5392_v31 = vld [vmem:[%s6880_s2 + $0x5a8] ss:$16 sps:$4 sm:$0xff]  }
  0xd0   : > { %1943 = vmatpush1.bf16.msra.mxu1 %v5302_v30  ;;  %1957 = vmatprep.subr.bf16.mxu0 %v5313_v32  ;;  %v5395_v30 = vld [vmem:[%s6880_s2 + $0x3e8] ss:$16 sps:$4 sm:$0xff]   ;;  %v5403_v32 = vld [vmem:[%s6880_s2 + $0x60c] ss:$16 sps:$4 sm:$0xff]  }
  0xd1   : > { %1944 = vmatprep.subr.bf16.mxu1 %v5310_v33  ;;  %v5400_v33 = vld [vmem:[%s6880_s2 + $0x5cc] ss:$16 sps:$4 sm:$0xff]  }
  0xd3   : > { %1958 = vmatpush1.bf16.msra.mxu0 %v5311_v35  ;;  %v5398_v35 = vld [vmem:[%s6880_s2 + $0x5c8] ss:$16 sps:$4 sm:$0xff]  }
  0xd4   : > { %1945 = vmatpush1.bf16.msra.mxu1 %v5308_v34  ;;  %1959 = vmatprep.subr.bf16.mxu0 %v5319_v36  ;;  %v5401_v34 = vld [vmem:[%s6880_s2 + $0x608] ss:$16 sps:$4 sm:$0xff]  }
  0xd5   : > { %1996 = vmatprep.subr.bf16.mxu1 %v5316_v37  ;;  %v5409_v36 = vld [vmem:[#allocation3 + $0x4] ss:$16 sps:$4 sm:$0xff]   ;;  %v5406_v37 = vld [vmem:[%s6880_s2 + $0x5ec] ss:$16 sps:$4 sm:$0xff]  }
  0xd7   : > { %1947 = vmatmul.mubr.bf16.vlgmr.msra.gmra.mrb[12].mxu1 %v6287_v19  ;;  %1960 = vmatpush1.bf16.msra.mxu0 %v5317_v38  ;;  %v5337_v19 = vld [vmem:[%s6880_s2 + $0x2ac] ss:$16 sps:$4 sm:$0xff]   ;;  %v5404_v38 = vld [vmem:[%s6880_s2 + $0x5e8] ss:$16 sps:$4 sm:$0xff]  }
  0xd8   : > { %1997 = vmatpush1.bf16.msra.mxu1 %v5314_v39  ;;  %1961 = vmatprep.subr.bf16.mxu0 %v5325_v40  ;;  %v5412_v39 = vld [vmem:[#allocation3 + $0xc] ss:$16 sps:$4 sm:$0xff]   ;;  %v5407_v40 = vld [vmem:[#allocation3] ss:$16 sps:$4 sm:$0xff]  }
  0xd9   : > { %1998 = vmatprep.subr.bf16.mxu1 %v5322_v59  ;;  %2028 = vmatprep.mubr.bf16.mxu1 %v6364_v45  ;;  %v5335_v45 = vld [vmem:[%s6880_s2 + $0x2a8] ss:$16 sps:$4 sm:$0xff]  }
  0xda   : > { %v5410_v59 = vld [vmem:[#allocation3 + $0x8] ss:$16 sps:$4 sm:$0xff]  }
  0xdb   : > { %1962 = vmatpush1.bf16.msra.mxu0 %v5323_v41  ;;  %v5415_v41 = vld [vmem:[#allocation3 + $0x24] ss:$16 sps:$4 sm:$0xff]  }
  0xdc   : > { %1999 = vmatpush1.bf16.msra.mxu1 %v5320_v42  ;;  %1963 = vmatprep.subr.bf16.mxu0 %v5331_v43  ;;  %v5418_v42 = vld [vmem:[#allocation3 + $0x2c] ss:$16 sps:$4 sm:$0xff]   ;;  %v5413_v43 = vld [vmem:[#allocation3 + $0x20] ss:$16 sps:$4 sm:$0xff]  }
  0xdd   : > { %2000 = vmatprep.subr.bf16.mxu1 %v5328_v44  ;;  %v5421_v44 = vld [vmem:[#allocation3 + $0x44] ss:$16 sps:$4 sm:$0xff]  }
  0xdf   : > { %1964 = vmatpush1.bf16.msra.mxu0 %v5329_v46  ;;  %v5419_v46 = vld [vmem:[#allocation3 + $0x40] ss:$16 sps:$4 sm:$0xff]  }
  0xe0   : > { %2001 = vmatpush1.bf16.msra.mxu1 %v5326_v47  ;;  %1965 = vmatprep.subr.bf16.mxu0 %v5337_v19  ;;  %v5422_v47 = vld [vmem:[#allocation3 + $0x48] ss:$16 sps:$4 sm:$0xff]   ;;  %v5427_v19 = vld [vmem:[#allocation3 + $0x64] ss:$16 sps:$4 sm:$0xff]  }
  0xe1   : > { %2002 = vmatprep.subr.bf16.mxu1 %v5334_v48  ;;  %v5430_v48 = vld [vmem:[#allocation3 + $0x6c] ss:$16 sps:$4 sm:$0xff]  }
  0xe3   : > { %1966 = vmatpush1.bf16.msra.mxu0 %v5335_v45  ;;  %v5425_v45 = vld [vmem:[#allocation3 + $0x60] ss:$16 sps:$4 sm:$0xff]  }
  0xe4   : > { %2003 = vmatpush1.bf16.msra.mxu1 %v5332_v49  ;;  %1967 = vmatprep.subr.bf16.mxu0 %v5343_v50  ;;  %v5428_v49 = vld [vmem:[#allocation3 + $0x68] ss:$16 sps:$4 sm:$0xff]   ;;  %v5436_v50 = vld [vmem:[#allocation3 + $0x8c] ss:$16 sps:$4 sm:$0xff]  }
  0xe5   : > { %2004 = vmatprep.subr.bf16.mxu1 %v5340_v51 }
  0xe7   : > { %1968 = vmatpush1.bf16.msra.mxu0 %v5341_v52 }
  0xe8   : > { %2005 = vmatpush1.bf16.msra.mxu1 %v5338_v53  ;;  %1969 = vmatprep.subr.bf16.mxu0 %v5349_v54 }
  0xe9   : > { %2006 = vmatprep.subr.bf16.mxu1 %v5346_v55 }
  0xeb   : > { %1970 = vmatpush1.bf16.msra.mxu0 %v5347_v56  ;;  %v5431_v56 = vld [vmem:[#allocation3 + $0x80] ss:$16 sps:$4 sm:$0xff]  }
  0xec   : > { %2007 = vmatpush1.bf16.msra.mxu1 %v5344_v57  ;;  %1971 = vmatprep.subr.bf16.mxu0 %v5355_v58  ;;  %v5434_v57 = vld [vmem:[#allocation3 + $0x88] ss:$16 sps:$4 sm:$0xff]  }
  0xed   : > { %2008 = vmatprep.subr.bf16.mxu1 %v5352_v60 }
  0xef   : > { %1972 = vmatpush1.bf16.msra.mxu0 %v5353_v61  ;;  %v5439_v61 = vld [vmem:[#allocation3 + $0xa4] ss:$16 sps:$4 sm:$0xff]  }
  0xf0   : > { %2009 = vmatpush1.bf16.msra.mxu1 %v5350_v62  ;;  %1973 = vmatprep.subr.bf16.mxu0 %v5361_v63  ;;  %v5442_v62 = vld [vmem:[#allocation3 + $0xac] ss:$16 sps:$4 sm:$0xff]   ;;  %v5437_v63 = vld [vmem:[#allocation3 + $0xa0] ss:$16 sps:$4 sm:$0xff]  }
  0xf1   : > { %2010 = vmatprep.subr.bf16.mxu1 %v5358_v0  ;;  %v5440_v0 = vld [vmem:[#allocation3 + $0xa8] ss:$16 sps:$4 sm:$0xff]  }
  0xf3   : > { %1974 = vmatpush1.bf16.msra.mxu0 %v5359_v2  ;;  %v5445_v2 = vld [vmem:[#allocation3 + $0xc4] ss:$16 sps:$4 sm:$0xff]  }
  0xf4   : > { %2011 = vmatpush1.bf16.msra.mxu1 %v5356_v3  ;;  %1975 = vmatprep.subr.bf16.mxu0 %v5367_v4  ;;  %v5448_v3 = vld [vmem:[#allocation3 + $0xcc] ss:$16 sps:$4 sm:$0xff]   ;;  %v5443_v4 = vld [vmem:[#allocation3 + $0xc0] ss:$16 sps:$4 sm:$0xff]  }
  0xf5   : > { %2012 = vmatprep.subr.bf16.mxu1 %v5364_v5  ;;  %v5446_v5 = vld [vmem:[#allocation3 + $0xc8] ss:$16 sps:$4 sm:$0xff]  }
  0xf7   : > { %1976 = vmatpush1.bf16.msra.mxu0 %v5365_v6  ;;  %v5451_v6 = vld [vmem:[#allocation3 + $0xe4] ss:$16 sps:$4 sm:$0xff]  }
  0xf8   : > { %2013 = vmatpush1.bf16.msra.mxu1 %v5362_v7  ;;  %1977 = vmatprep.subr.bf16.mxu0 %v5373_v8  ;;  %v5454_v7 = vld [vmem:[#allocation3 + $0xec] ss:$16 sps:$4 sm:$0xff]   ;;  %v5449_v8 = vld [vmem:[#allocation3 + $0xe0] ss:$16 sps:$4 sm:$0xff]  }
  0xf9   : > { %2014 = vmatprep.subr.bf16.mxu1 %v5370_v9  ;;  %v5452_v9 = vld [vmem:[#allocation3 + $0xe8] ss:$16 sps:$4 sm:$0xff]  }
  0xfb   : > { %1978 = vmatpush1.bf16.msra.mxu0 %v5371_v10  ;;  %v5457_v10 = vld [vmem:[#allocation3 + $0x104] ss:$16 sps:$4 sm:$0xff]  }
  0xfc   : > { %2015 = vmatpush1.bf16.msra.mxu1 %v5368_v11  ;;  %1979 = vmatprep.subr.bf16.mxu0 %v5379_v12  ;;  %v5455_v11 = vld [vmem:[#allocation3 + $0x100] ss:$16 sps:$4 sm:$0xff]   ;;  %v5460_v12 = vld [vmem:[#allocation3 + $0x10c] ss:$16 sps:$4 sm:$0xff]  }
  0xfd   : > { %2016 = vmatprep.subr.bf16.mxu1 %v5376_v13  ;;  %v5458_v13 = vld [vmem:[#allocation3 + $0x108] ss:$16 sps:$4 sm:$0xff]  }
  0xff   : > { %1980 = vmatpush1.bf16.msra.mxu0 %v5377_v14  ;;  %v5463_v14 = vld [vmem:[#allocation3 + $0x124] ss:$16 sps:$4 sm:$0xff]  }
 0x100   : > { %2017 = vmatpush1.bf16.msra.mxu1 %v5374_v15  ;;  %1981 = vmatprep.subr.bf16.mxu0 %v5385_v16  ;;  %v5461_v15 = vld [vmem:[#allocation3 + $0x120] ss:$16 sps:$4 sm:$0xff]   ;;  %v5466_v16 = vld [vmem:[#allocation3 + $0x12c] ss:$16 sps:$4 sm:$0xff]  }
 0x101   : > { %2018 = vmatprep.subr.bf16.mxu1 %v5382_v17  ;;  %v5464_v17 = vld [vmem:[#allocation3 + $0x128] ss:$16 sps:$4 sm:$0xff]  }
 0x103   : > { %1982 = vmatpush1.bf16.msra.mxu0 %v5383_v18  ;;  %v5469_v18 = vld [vmem:[#allocation3 + $0x144] ss:$16 sps:$4 sm:$0xff]  }
 0x104   : > { %2019 = vmatpush1.bf16.msra.mxu1 %v5380_v21  ;;  %1983 = vmatprep.subr.bf16.mxu0 %v5391_v22  ;;  %v5467_v21 = vld [vmem:[#allocation3 + $0x140] ss:$16 sps:$4 sm:$0xff]   ;;  %v5472_v22 = vld [vmem:[#allocation3 + $0x14c] ss:$16 sps:$4 sm:$0xff]  }
 0x105   : > { %2020 = vmatprep.subr.bf16.mxu1 %v5388_v23  ;;  %v5470_v23 = vld [vmem:[#allocation3 + $0x148] ss:$16 sps:$4 sm:$0xff]  }
 0x107   : > { %1984 = vmatpush1.bf16.msra.mxu0 %v5389_v24  ;;  %v5475_v24 = vld [vmem:[#allocation3 + $0x164] ss:$16 sps:$4 sm:$0xff]  }
 0x108   : > { %2021 = vmatpush1.bf16.msra.mxu1 %v5386_v25  ;;  %1985 = vmatprep.subr.bf16.mxu0 %v5397_v26  ;;  %v5473_v25 = vld [vmem:[#allocation3 + $0x160] ss:$16 sps:$4 sm:$0xff]   ;;  %v5478_v26 = vld [vmem:[#allocation3 + $0x16c] ss:$16 sps:$4 sm:$0xff]  }
 0x109   : > { %2022 = vmatprep.subr.bf16.mxu1 %v5394_v27  ;;  %v5476_v27 = vld [vmem:[#allocation3 + $0x168] ss:$16 sps:$4 sm:$0xff]  }
 0x10b   : > { %1986 = vmatpush1.bf16.msra.mxu0 %v5395_v30  ;;  %v5481_v30 = vld [vmem:[#allocation3 + $0x184] ss:$16 sps:$4 sm:$0xff]  }
 0x10c   : > { %2023 = vmatpush1.bf16.msra.mxu1 %v5392_v31  ;;  %2037 = vmatprep.subr.bf16.mxu0 %v5403_v32  ;;  %v5479_v31 = vld [vmem:[#allocation3 + $0x180] ss:$16 sps:$4 sm:$0xff]   ;;  %v5484_v32 = vld [vmem:[#allocation3 + $0x18c] ss:$16 sps:$4 sm:$0xff]  }
 0x10d   : > { %2024 = vmatprep.subr.bf16.mxu1 %v5400_v33  ;;  %v5482_v33 = vld [vmem:[#allocation3 + $0x188] ss:$16 sps:$4 sm:$0xff]  }
 0x10e   : > { %1988 = vmatmul.mubr.bf16.vlgmr.msra.gmra.mrb[12].mxu0 %v6289_v20  ;;  %v5416_v20 = vld [vmem:[#allocation3 + $0x28] ss:$16 sps:$4 sm:$0xff]  }
 0x10f   : > { %2038 = vmatpush1.bf16.msra.mxu0 %v5401_v34  ;;  %2069 = vmatprep.mubr.bf16.mxu0 %v5903_v1  ;;  %v5424_v1 = vld [vmem:[#allocation3 + $0x4c] ss:$16 sps:$4 sm:$0xff]   ;;  %v5487_v34 = vld [vmem:[#allocation3 + $0x1a4] ss:$16 sps:$4 sm:$0xff]  }
 0x110   : > { %2025 = vmatpush1.bf16.msra.mxu1 %v5398_v35  ;;  %2910 = vmatprep.subr.bf16.mxu0 %v5409_v36  ;;  %v5485_v35 = vld [vmem:[#allocation3 + $0x1a0] ss:$16 sps:$4 sm:$0xff]   ;;  %v5490_v36 = vld [vmem:[#allocation3 + $0x1ac] ss:$16 sps:$4 sm:$0xff]  }
 0x111   : > { %2026 = vmatprep.subr.bf16.mxu1 %v5406_v37  ;;  %v5488_v37 = vld [vmem:[#allocation3 + $0x1a8] ss:$16 sps:$4 sm:$0xff]  }
 0x114   : > { %2027 = vmatpush1.bf16.msra.mxu1 %v5404_v38  ;;  %v5493_v38 = vld [vmem:[#allocation3 + $0x1c4] ss:$16 sps:$4 sm:$0xff]  }
 0x115   : > { %2992 = vmatprep.subr.bf16.mxu1 %v5412_v39  ;;  %v5491_v39 = vld [vmem:[#allocation3 + $0x1c0] ss:$16 sps:$4 sm:$0xff]  }
 0x116   : > { %4714 = vmatmul.mubr.msk.bf16.vlgmr.msra.gmra.mrb[16].mxu0 %vm1746_vm2, %v6316_v29  ;;  %v5433_v29 = vld [vmem:[#allocation3 + $0x84] ss:$16 sps:$4 sm:$0xff]  }
 0x117   : > { %2029 = vmatmul.mubr.bf16.vlgmr.msra.gmra.mrb[16].mxu1 %v6491_v28  ;;  %2911 = vmatpush1.bf16.msra.mxu0 %v5407_v40  ;;  %v5496_v40 = vld [vmem:[#allocation3 + $0x1cc] ss:$16 sps:$4 sm:$0xff]  }
 0x118   : > { %2993 = vmatpush1.bf16.msra.mxu1 %v5410_v59  ;;  %2912 = vmatprep.subr.bf16.mxu0 %v5415_v41  ;;  %v5494_v59 = vld [vmem:[#allocation3 + $0x1c8] ss:$16 sps:$4 sm:$0xff]   ;;  %v5499_v41 = vld [vmem:[#allocation3 + $0x1e4] ss:$16 sps:$4 sm:$0xff]  }
 0x119   : > { %2994 = vmatprep.subr.bf16.mxu1 %v5418_v42  ;;  %v5497_v42 = vld [vmem:[#allocation3 + $0x1e0] ss:$16 sps:$4 sm:$0xff]  }
 0x11b   : > { %2913 = vmatpush1.bf16.msra.mxu0 %v5413_v43  ;;  %v5502_v43 = vld [vmem:[#allocation3 + $0x1ec] ss:$16 sps:$4 sm:$0xff]  }
 0x11c   : > { %2995 = vmatpush1.bf16.msra.mxu1 %v5416_v20  ;;  %2914 = vmatprep.subr.bf16.mxu0 %v5421_v44  ;;  %v5500_v20 = vld [vmem:[#allocation3 + $0x1e8] ss:$16 sps:$4 sm:$0xff]   ;;  %v5505_v44 = vld [vmem:[#allocation3 + $0x204] ss:$16 sps:$4 sm:$0xff]  }
 0x11d   : > { %2996 = vmatprep.subr.bf16.mxu1 %v5424_v1  ;;  %v5508_v1 = vld [vmem:[#allocation3 + $0x20c] ss:$16 sps:$4 sm:$0xff]  }
 0x11f   : > { %2915 = vmatpush1.bf16.msra.mxu0 %v5419_v46 }
 0x120   : > { %2997 = vmatpush1.bf16.msra.mxu1 %v5422_v47  ;;  %2916 = vmatprep.subr.bf16.mxu0 %v5427_v19 }
 0x121   : > { %v6706_v28 = vpop.f32.mrb[0].mxu0  ;;  %v6708_v51 = vpop.f32.mrb[0].mxu1  ;;  %2998 = vmatprep.subr.bf16.mxu1 %v5430_v48 }
 0x122   : > { %v6710_v52 = vpop.f32.mrb[1].mxu0  ;;  %v6712_v53 = vpop.f32.mrb[1].mxu1 }
 0x123   : > { %v722_v54 = vpop.f32.mrb[2].mxu0  ;;  %v763_v55 = vpop.f32.mrb[2].mxu1  ;;  %2917 = vmatpush1.bf16.msra.mxu0 %v5425_v45 }
 0x124   : > { %v723_v58 = vpop.f32.mrb[3].mxu0  ;;  %v764_v60 = vpop.f32.mrb[3].mxu1  ;;  %2999 = vmatpush1.bf16.msra.mxu1 %v5428_v49  ;;  %2918 = vmatprep.subr.bf16.mxu0 %v5433_v29 }
 0x125   : > { %3000 = vmatprep.subr.bf16.mxu1 %v5436_v50 }
 0x127   : > { %2919 = vmatpush1.bf16.msra.mxu0 %v5431_v56 }
 0x128   : > { %3001 = vmatpush1.bf16.msra.mxu1 %v5434_v57  ;;  %2920 = vmatprep.subr.bf16.mxu0 %v5439_v61 }
 0x129   : > { %3002 = vmatprep.subr.bf16.mxu1 %v5442_v62 }
 0x12b   : > { %2921 = vmatpush1.bf16.msra.mxu0 %v5437_v63  ;;  %v2080_v63 = vlaneseq }
 0x12c   : > { %3003 = vmatpush1.bf16.msra.mxu1 %v5440_v0  ;;  %2922 = vmatprep.subr.bf16.mxu0 %v5445_v2 }
 0x12d   : > { %3004 = vmatprep.subr.bf16.mxu1 %v5448_v3  ;;  %v6716_v0 = vshrl.u32 %v2080_v63, 7  ;;  %v5562_v63 = vld [vmem:[#allocation3 + $0x32c] ss:$16 sps:$4 sm:$0xff]  }
 0x12f   : > { %2923 = vmatpush1.bf16.msra.mxu0 %v5443_v4  ;;  %v6727_v2 = vsub.s32 1, %v6716_v0 }
 0x130   : > { %3005 = vmatpush1.bf16.msra.mxu1 %v5446_v5  ;;  %2924 = vmatprep.subr.bf16.mxu0 %v5451_v6 }
 0x131   : > { %3006 = vmatprep.subr.bf16.mxu1 %v5454_v7 }
 0x133   : > { %2925 = vmatpush1.bf16.msra.mxu0 %v5449_v8 }
 0x134   : > { %3007 = vmatpush1.bf16.msra.mxu1 %v5452_v9  ;;  %2926 = vmatprep.subr.bf16.mxu0 %v5457_v10 }
 0x135   : > { %3008 = vmatprep.subr.bf16.mxu1 %v5460_v12 }
 0x137   : > { %2927 = vmatpush1.bf16.msra.mxu0 %v5455_v11 }
 0x138   : > { %3009 = vmatpush1.bf16.msra.mxu1 %v5458_v13  ;;  %2928 = vmatprep.subr.bf16.mxu0 %v5463_v14 }
 0x139   : > { %3010 = vmatprep.subr.bf16.mxu1 %v5466_v16 }
 0x13b   : > { %2929 = vmatpush1.bf16.msra.mxu0 %v5461_v15 }
 0x13c   : > { %3011 = vmatpush1.bf16.msra.mxu1 %v5464_v17  ;;  %2930 = vmatprep.subr.bf16.mxu0 %v5469_v18 }
 0x13d   : > { %3012 = vmatprep.subr.bf16.mxu1 %v5472_v22 }
 0x13f   : > { %2931 = vmatpush1.bf16.msra.mxu0 %v5467_v21 }
 0x140   : > { %3013 = vmatpush1.bf16.msra.mxu1 %v5470_v23  ;;  %2932 = vmatprep.subr.bf16.mxu0 %v5475_v24 }
 0x141   : > { %3014 = vmatprep.subr.bf16.mxu1 %v5478_v26 }
 0x143   : > { %2933 = vmatpush1.bf16.msra.mxu0 %v5473_v25 }
 0x144   : > { %3015 = vmatpush1.bf16.msra.mxu1 %v5476_v27  ;;  %2934 = vmatprep.subr.bf16.mxu0 %v5481_v30  ;;  %v5503_v27 = vld [vmem:[#allocation3 + $0x200] ss:$16 sps:$4 sm:$0xff]   ;;  %v5506_v30 = vld [vmem:[#allocation3 + $0x208] ss:$16 sps:$4 sm:$0xff]  }
 0x145   : > { %3016 = vmatprep.subr.bf16.mxu1 %v5484_v32 }
 0x147   : > { %2935 = vmatpush1.bf16.msra.mxu0 %v5479_v31 }
 0x148   : > { %3017 = vmatpush1.bf16.msra.mxu1 %v5482_v33  ;;  %2936 = vmatprep.subr.bf16.mxu0 %v5487_v34  ;;  %v5511_v33 = vld [vmem:[#allocation3 + $0x224] ss:$16 sps:$4 sm:$0xff]   ;;  %v5514_v34 = vld [vmem:[#allocation3 + $0x22c] ss:$16 sps:$4 sm:$0xff]  }
 0x149   : > { %3018 = vmatprep.subr.bf16.mxu1 %v5490_v36  ;;  %v5520_v36 = vld [vmem:[#allocation3 + $0x24c] ss:$16 sps:$4 sm:$0xff]  }
 0x14b   : > { %2937 = vmatpush1.bf16.msra.mxu0 %v5485_v35  ;;  %v5512_v35 = vld [vmem:[#allocation3 + $0x228] ss:$16 sps:$4 sm:$0xff]  }
 0x14c   : > { %3019 = vmatpush1.bf16.msra.mxu1 %v5488_v37  ;;  %2938 = vmatprep.subr.bf16.mxu0 %v5493_v38  ;;  %v5515_v37 = vld [vmem:[#allocation3 + $0x240] ss:$16 sps:$4 sm:$0xff]   ;;  %v5518_v38 = vld [vmem:[#allocation3 + $0x248] ss:$16 sps:$4 sm:$0xff]  }
 0x14d   : > { %3020 = vmatprep.subr.bf16.mxu1 %v5496_v40  ;;  %v5526_v40 = vld [vmem:[#allocation3 + $0x26c] ss:$16 sps:$4 sm:$0xff]  }
 0x14f   : > { %2939 = vmatpush1.bf16.msra.mxu0 %v5491_v39  ;;  %v5523_v39 = vld [vmem:[#allocation3 + $0x264] ss:$16 sps:$4 sm:$0xff]  }
 0x150   : > { %3021 = vmatpush1.bf16.msra.mxu1 %v5494_v59  ;;  %2940 = vmatprep.subr.bf16.mxu0 %v5499_v41  ;;  %v5521_v59 = vld [vmem:[#allocation3 + $0x260] ss:$16 sps:$4 sm:$0xff]   ;;  %v5524_v41 = vld [vmem:[#allocation3 + $0x268] ss:$16 sps:$4 sm:$0xff]  }
 0x151   : > { %3022 = vmatprep.subr.bf16.mxu1 %v5502_v43  ;;  %v5532_v43 = vld [vmem:[#allocation3 + $0x28c] ss:$16 sps:$4 sm:$0xff]  }
 0x153   : > { %2941 = vmatpush1.bf16.msra.mxu0 %v5497_v42  ;;  %v5529_v42 = vld [vmem:[#allocation3 + $0x284] ss:$16 sps:$4 sm:$0xff]  }
 0x154   : > { %3023 = vmatpush1.bf16.msra.mxu1 %v5500_v20  ;;  %2951 = vmatprep.subr.bf16.mxu0 %v5505_v44  ;;  %v5527_v20 = vld [vmem:[#allocation3 + $0x280] ss:$16 sps:$4 sm:$0xff]   ;;  %v5530_v44 = vld [vmem:[#allocation3 + $0x288] ss:$16 sps:$4 sm:$0xff]  }
 0x155   : > { %3033 = vmatprep.subr.bf16.mxu1 %v5508_v1  ;;  %v5535_v1 = vld [vmem:[#allocation3 + $0x2a4] ss:$16 sps:$4 sm:$0xff]  }
 0x161   : > { %v1784_v46 = vpop.f32.mrb[4].mxu0  ;;  %v1825_v19 = vpop.f32.mrb[4].mxu1 }
 0x162   : > { %v1785_v47 = vadd.f32 %v1784_v46, %v6706_v28  ;;  %v1786_v48 = vpop.f32.mrb[5].mxu0  ;;  %v1827_v49 = vpop.f32.mrb[5].mxu1  ;;  %v6719_v28 = vsub.s32 0, %v6716_v0  ;;  %v5538_v46 = vld [vmem:[#allocation3 + $0x2ac] ss:$16 sps:$4 sm:$0xff]  }
 0x163   : > { %v1787_v45 = vadd.f32 %v1786_v48, %v6710_v52  ;;  %v1788_v29 = vpop.f32.mrb[6].mxu0  ;;  %v1829_v54 = vpop.f32.mrb[6].mxu1  ;;  %v6724_v52 = vld [vmem:[%s6882_s4] sm:$0xf]  ;;  %v5541_v48 = vld [vmem:[#allocation3 + $0x2c4] ss:$16 sps:$4 sm:$0xff]  }
 0x164   : > { %v1826_v50 = vadd.f32 %v1825_v19, %v1785_v47  ;;  %v1789_v55 = vpop.f32.mrb[7].mxu0  ;;  %v1830_v57 = vpop.f32.mrb[7].mxu1  ;;  %v2083_v5 = vrot.slane %v6724_v52, %v6719_v28  ;;  %v2087_v8 = vrot.slane %v6724_v52, %v6727_v2  ;;  %v5533_v47 = vld [vmem:[#allocation3 + $0x2a0] ss:$16 sps:$4 sm:$0xff]   ;;  %v5536_v19 = vld [vmem:[#allocation3 + $0x2a8] ss:$16 sps:$4 sm:$0xff]  }
 0x165   : > { %v1828_v56 = vadd.f32 %v1827_v49, %v1787_v45  ;;  %v5544_v45 = vld [vmem:[#allocation3 + $0x2cc] ss:$16 sps:$4 sm:$0xff]   ;;  %v5539_v49 = vld [vmem:[#allocation3 + $0x2c0] ss:$16 sps:$4 sm:$0xff]   ;;  %v5542_v29 = vld [vmem:[#allocation3 + $0x2c8] ss:$16 sps:$4 sm:$0xff]  }
 0x166   : > { %v5550_v54 = vld [vmem:[#allocation3 + $0x2ec] ss:$16 sps:$4 sm:$0xff]   ;;  %v5545_v55 = vld [vmem:[#allocation3 + $0x2e0] ss:$16 sps:$4 sm:$0xff]   ;;  %v5553_v57 = vld [vmem:[#allocation3 + $0x304] ss:$16 sps:$4 sm:$0xff]  }
 0x169   : > { %v1907_v58 = vpop.f32.mrb[8].mxu1 }
 0x16a   : > { %v1909_v60 = vpop.f32.mrb[9].mxu1 }
 0x16b   : > { %v1911_v61 = vpop.f32.mrb[10].mxu1 }
 0x16c   : > { %v1912_v62 = vpop.f32.mrb[11].mxu1  ;;  %v5554_v61 = vld [vmem:[#allocation3 + $0x308] ss:$16 sps:$4 sm:$0xff]  }
 0x16d   : > { %v5559_v62 = vld [vmem:[#allocation3 + $0x324] ss:$16 sps:$4 sm:$0xff]  }
 0x1a1   : > { %v1866_v3 = vpop.f32.mrb[8].mxu0 }
 0x1a2   : > { %v1867_v4 = vadd.f32 %v1866_v3, %v1826_v50  ;;  %v1868_v6 = vpop.f32.mrb[9].mxu0  ;;  %v5547_v50 = vld [vmem:[#allocation3 + $0x2e4] ss:$16 sps:$4 sm:$0xff]   ;;  %v5557_v3 = vld [vmem:[#allocation3 + $0x320] ss:$16 sps:$4 sm:$0xff]  }
 0x1a3   : > { %v1869_v7 = vadd.f32 %v1868_v6, %v1828_v56  ;;  %v1870_v9 = vpop.f32.mrb[10].mxu0  ;;  %v5548_v56 = vld [vmem:[#allocation3 + $0x2e8] ss:$16 sps:$4 sm:$0xff]   ;;  %v5568_v6 = vld [vmem:[#allocation3 + $0x34c] ss:$16 sps:$4 sm:$0xff]  }
 0x1a4   : > { %v1908_v10 = vadd.f32 %v1907_v58, %v1867_v4  ;;  %v1871_v11 = vpop.f32.mrb[11].mxu0  ;;  %v5556_v58 = vld [vmem:[#allocation3 + $0x30c] ss:$16 sps:$4 sm:$0xff]   ;;  %v5560_v4 = vld [vmem:[#allocation3 + $0x328] ss:$16 sps:$4 sm:$0xff]  }
 0x1a5   : > { %v1910_v12 = vadd.f32 %v1909_v60, %v1869_v7  ;;  %v5551_v60 = vld [vmem:[#allocation3 + $0x300] ss:$16 sps:$4 sm:$0xff]   ;;  %v5571_v9 = vld [vmem:[#allocation3 + $0x364] ss:$16 sps:$4 sm:$0xff]  }
 0x1a6   : > { %v2100_v13 = vadd.f32 %v2083_v5, %v1908_v10  ;;  %v5565_v5 = vld [vmem:[#allocation3 + $0x344] ss:$16 sps:$4 sm:$0xff]   ;;  %v5563_v7 = vld [vmem:[#allocation3 + $0x340] ss:$16 sps:$4 sm:$0xff]   ;;  %v5574_v10 = vld [vmem:[#allocation3 + $0x36c] ss:$16 sps:$4 sm:$0xff]  }
 0x1a7   : > { %v2101_v14 = vadd.f32 %v2087_v8, %v1910_v12  ;;  %v5566_v8 = vld [vmem:[#allocation3 + $0x348] ss:$16 sps:$4 sm:$0xff]   ;;  %v5569_v11 = vld [vmem:[#allocation3 + $0x360] ss:$16 sps:$4 sm:$0xff]  }
 0x1a8   : > { %vm2104_vm3 = vcmp.gt.f32.partialorder %v2100_v13, 0.0  ;;  %v2108_v15 = vmul.f32 0.2, %v2100_v13  ;;  %v5572_v12 = vld [vmem:[#allocation3 + $0x368] ss:$16 sps:$4 sm:$0xff]  }
 0x1a9   : > { %vm2105_vm4 = vcmp.gt.f32.partialorder %v2101_v14, 0.0  ;;  %v2109_v16 = vmul.f32 0.2, %v2101_v14 }
 0x1aa   : > { %v1948_v17 = vpop.f32.mrb[12].mxu1  ;;  %v2112_v18 = vsel %vm2104_vm3, %v2100_v13, %v2108_v15  ;;  %v5577_v13 = vld [vmem:[#allocation3 + $0x384] ss:$16 sps:$4 sm:$0xff]   ;;  %v5575_v15 = vld [vmem:[#allocation3 + $0x380] ss:$16 sps:$4 sm:$0xff]  }
 0x1ab   : > { %v6734_v21 = vadd.f32 %v1948_v17, %v6708_v51  ;;  %v1950_v22 = vpop.f32.mrb[13].mxu1  ;;  %v2113_v23 = vsel %vm2105_vm4, %v2101_v14, %v2109_v16  ;;  %v2116_v32 = vpack.c.bf16 %v2112_v18, %v2112_v18  ;;  %v5509_v51 = vld [vmem:[#allocation3 + $0x220] ss:$16 sps:$4 sm:$0xff]   ;;  %v5580_v14 = vld [vmem:[#allocation3 + $0x38c] ss:$16 sps:$4 sm:$0xff]  }
 0x1ac   : > { %v6737_v24 = vadd.f32 %v1950_v22, %v6712_v53  ;;  %v1952_v25 = vpop.f32.mrb[14].mxu1  ;;  %v2117_v26 = vpack.c.bf16 %v2113_v23, %v2113_v23  ;;  %v5517_v53 = vld [vmem:[#allocation3 + $0x244] ss:$16 sps:$4 sm:$0xff]   ;;  %v5578_v16 = vld [vmem:[#allocation3 + $0x388] ss:$16 sps:$4 sm:$0xff]  }
 0x1ad   : > { %v1953_v31 = vpop.f32.mrb[15].mxu1  ;;  %v5583_v17 = vld [vmem:[#allocation3 + $0x3a4] ss:$16 sps:$4 sm:$0xff]   ;;  %v5586_v18 = vld [vmem:[#allocation3 + $0x3ac] ss:$16 sps:$4 sm:$0xff]  }
 0x1ae   : > { %2942 = vmatprep.mubr.bf16.mxu0 %v2117_v26  ;;  %3024 = vmatprep.mubr.bf16.mxu1 %v2117_v26  ;;  %v5581_v22 = vld [vmem:[#allocation3 + $0x3a0] ss:$16 sps:$4 sm:$0xff]   ;;  %v5584_v23 = vld [vmem:[#allocation3 + $0x3a8] ss:$16 sps:$4 sm:$0xff]   ;;  %v5589_v26 = vld [vmem:[#allocation3 + $0x3c4] ss:$16 sps:$4 sm:$0xff]  }
 0x1af   : > { %2943 = vmatmul.mubr.bf16.vlgmr.msra.gmra.mrb[20].mxu0 %v2116_v32  ;;  %3025 = vmatmul.mubr.bf16.vlgmr.msra.gmra.mrb[20].mxu1 %v2116_v32 }
 0x1b0   : > { %2952 = vmatpush1.bf16.msra.mxu0 %v5503_v27  ;;  %3034 = vmatpush1.bf16.msra.mxu1 %v5506_v30  ;;  %v5592_v27 = vld [vmem:[#allocation3 + $0x3cc] ss:$16 sps:$4 sm:$0xff]  }
 0x1b1   : > { %2953 = vmatprep.subr.bf16.mxu0 %v5511_v33  ;;  %3035 = vmatprep.subr.bf16.mxu1 %v5514_v34 }
 0x1b4   : > { %2954 = vmatpush1.bf16.msra.mxu0 %v5509_v51  ;;  %3036 = vmatpush1.bf16.msra.mxu1 %v5512_v35  ;;  %v5587_v51 = vld [vmem:[#allocation3 + $0x3c0] ss:$16 sps:$4 sm:$0xff]   ;;  %v5590_v35 = vld [vmem:[#allocation3 + $0x3c8] ss:$16 sps:$4 sm:$0xff]  }
 0x1b5   : > { %2955 = vmatprep.subr.bf16.mxu0 %v5517_v53  ;;  %3037 = vmatprep.subr.bf16.mxu1 %v5520_v36  ;;  %v5595_v53 = vld [vmem:[#allocation3 + $0x3e4] ss:$16 sps:$4 sm:$0xff]   ;;  %v5598_v36 = vld [vmem:[#allocation3 + $0x3ec] ss:$16 sps:$4 sm:$0xff]  }
 0x1b8   : > { %2956 = vmatpush1.bf16.msra.mxu0 %v5515_v37  ;;  %3038 = vmatpush1.bf16.msra.mxu1 %v5518_v38  ;;  %v6742_v37 = vsub.s32 2, %v6716_v0  ;;  %v6745_v38 = vsub.s32 3, %v6716_v0 }
 0x1b9   : > { %2957 = vmatprep.subr.bf16.mxu0 %v5523_v39  ;;  %3039 = vmatprep.subr.bf16.mxu1 %v5526_v40  ;;  %v5601_v40 = vld [vmem:[#allocation5 + $0x4] ss:$16 sps:$4 sm:$0xff]  }
 0x1bc   : > { %2958 = vmatpush1.bf16.msra.mxu0 %v5521_v59  ;;  %3040 = vmatpush1.bf16.msra.mxu1 %v5524_v41  ;;  %v5604_v59 = vld [vmem:[#allocation5 + $0xc] ss:$16 sps:$4 sm:$0xff]  }
 0x1bd   : > { %2959 = vmatprep.subr.bf16.mxu0 %v5529_v42  ;;  %3041 = vmatprep.subr.bf16.mxu1 %v5532_v43 }
 0x1c0   : > { %2960 = vmatpush1.bf16.msra.mxu0 %v5527_v20  ;;  %3042 = vmatpush1.bf16.msra.mxu1 %v5530_v44  ;;  %v2091_v44 = vrot.slane %v6724_v52, %v6742_v37 }
 0x1c1   : > { %2961 = vmatprep.subr.bf16.mxu0 %v5535_v1  ;;  %3043 = vmatprep.subr.bf16.mxu1 %v5538_v46 }
 0x1c4   : > { %2962 = vmatpush1.bf16.msra.mxu0 %v5533_v47  ;;  %3044 = vmatpush1.bf16.msra.mxu1 %v5536_v19  ;;  %v2095_v47 = vrot.slane %v6724_v52, %v6745_v38 }
 0x1c5   : > { %2963 = vmatprep.subr.bf16.mxu0 %v5541_v48  ;;  %3045 = vmatprep.subr.bf16.mxu1 %v5544_v45 }
 0x1c8   : > { %2964 = vmatpush1.bf16.msra.mxu0 %v5539_v49  ;;  %3046 = vmatpush1.bf16.msra.mxu1 %v5542_v29 }
 0x1c9   : > { %2965 = vmatprep.subr.bf16.mxu0 %v5547_v50  ;;  %3047 = vmatprep.subr.bf16.mxu1 %v5550_v54 }
 0x1cc   : > { %2966 = vmatpush1.bf16.msra.mxu0 %v5545_v55  ;;  %3048 = vmatpush1.bf16.msra.mxu1 %v5548_v56 }
 0x1cd   : > { %2967 = vmatprep.subr.bf16.mxu0 %v5553_v57  ;;  %3049 = vmatprep.subr.bf16.mxu1 %v5556_v58 }
 0x1d0   : > { %2968 = vmatpush1.bf16.msra.mxu0 %v5551_v60  ;;  %3050 = vmatpush1.bf16.msra.mxu1 %v5554_v61  ;;  %v5599_v60 = vld [vmem:[#allocation5] ss:$16 sps:$4 sm:$0xff]   ;;  %v5602_v61 = vld [vmem:[#allocation5 + $0x8] ss:$16 sps:$4 sm:$0xff]  }
 0x1d1   : > { %2969 = vmatprep.subr.bf16.mxu0 %v5559_v62  ;;  %3051 = vmatprep.subr.bf16.mxu1 %v5562_v63  ;;  %v5607_v62 = vld [vmem:[#allocation5 + $0x24] ss:$16 sps:$4 sm:$0xff]   ;;  %v5610_v63 = vld [vmem:[#allocation5 + $0x2c] ss:$16 sps:$4 sm:$0xff]  }
 0x1d4   : > { %2970 = vmatpush1.bf16.msra.mxu0 %v5557_v3  ;;  %3052 = vmatpush1.bf16.msra.mxu1 %v5560_v4  ;;  %v5605_v3 = vld [vmem:[#allocation5 + $0x20] ss:$16 sps:$4 sm:$0xff]   ;;  %v5608_v4 = vld [vmem:[#allocation5 + $0x28] ss:$16 sps:$4 sm:$0xff]  }
 0x1d5   : > { %2971 = vmatprep.subr.bf16.mxu0 %v5565_v5  ;;  %3053 = vmatprep.subr.bf16.mxu1 %v5568_v6  ;;  %v5613_v5 = vld [vmem:[#allocation5 + $0x44] ss:$16 sps:$4 sm:$0xff]   ;;  %v5616_v6 = vld [vmem:[#allocation5 + $0x4c] ss:$16 sps:$4 sm:$0xff]  }
 0x1d8   : > { %2972 = vmatpush1.bf16.msra.mxu0 %v5563_v7  ;;  %3054 = vmatpush1.bf16.msra.mxu1 %v5566_v8  ;;  %v5611_v7 = vld [vmem:[#allocation5 + $0x40] ss:$16 sps:$4 sm:$0xff]   ;;  %v5614_v8 = vld [vmem:[#allocation5 + $0x48] ss:$16 sps:$4 sm:$0xff]  }
 0x1d9   : > { %2973 = vmatprep.subr.bf16.mxu0 %v5571_v9  ;;  %3055 = vmatprep.subr.bf16.mxu1 %v5574_v10  ;;  %v5619_v9 = vld [vmem:[#allocation5 + $0x64] ss:$16 sps:$4 sm:$0xff]   ;;  %v5622_v10 = vld [vmem:[#allocation5 + $0x6c] ss:$16 sps:$4 sm:$0xff]  }
 0x1dc   : > { %2974 = vmatpush1.bf16.msra.mxu0 %v5569_v11  ;;  %3056 = vmatpush1.bf16.msra.mxu1 %v5572_v12  ;;  %v5617_v11 = vld [vmem:[#allocation5 + $0x60] ss:$16 sps:$4 sm:$0xff]   ;;  %v5620_v12 = vld [vmem:[#allocation5 + $0x68] ss:$16 sps:$4 sm:$0xff]  }
 0x1dd   : > { %2975 = vmatprep.subr.bf16.mxu0 %v5577_v13  ;;  %3057 = vmatprep.subr.bf16.mxu1 %v5580_v14  ;;  %v5625_v13 = vld [vmem:[#allocation5 + $0x84] ss:$16 sps:$4 sm:$0xff]   ;;  %v5628_v14 = vld [vmem:[#allocation5 + $0x8c] ss:$16 sps:$4 sm:$0xff]  }
 0x1e0   : > { %2976 = vmatpush1.bf16.msra.mxu0 %v5575_v15  ;;  %3058 = vmatpush1.bf16.msra.mxu1 %v5578_v16  ;;  %v5623_v15 = vld [vmem:[#allocation5 + $0x80] ss:$16 sps:$4 sm:$0xff]   ;;  %v5626_v16 = vld [vmem:[#allocation5 + $0x88] ss:$16 sps:$4 sm:$0xff]  }
 0x1e1   : > { %v1989_v25 = vpop.f32.mrb[12].mxu0  ;;  %2977 = vmatprep.subr.bf16.mxu0 %v5583_v17  ;;  %3059 = vmatprep.subr.bf16.mxu1 %v5586_v18  ;;  %v5631_v17 = vld [vmem:[#allocation5 + $0xa4] ss:$16 sps:$4 sm:$0xff]   ;;  %v5634_v18 = vld [vmem:[#allocation5 + $0xac] ss:$16 sps:$4 sm:$0xff]  }
 0x1e2   : > { %v1990_v30 = vadd.f32 %v1989_v25, %v6734_v21  ;;  %v1991_v31 = vpop.f32.mrb[13].mxu0  ;;  %v5593_v21 = vld [vmem:[#allocation3 + $0x3e0] ss:$16 sps:$4 sm:$0xff]   ;;  %v5637_v25 = vld [vmem:[#allocation5 + $0xc4] ss:$16 sps:$4 sm:$0xff]  }
 0x1e3   : > { %v1992_v32 = vadd.f32 %v1991_v31, %v6737_v24  ;;  %v1993_v33 = vpop.f32.mrb[14].mxu0  ;;  %v5596_v24 = vld [vmem:[#allocation3 + $0x3e8] ss:$16 sps:$4 sm:$0xff]   ;;  %v5643_v31 = vld [vmem:[#allocation5 + $0xe4] ss:$16 sps:$4 sm:$0xff]  }
 0x1e4   : > { %v1994_v34 = vpop.f32.mrb[15].mxu0  ;;  %2978 = vmatpush1.bf16.msra.mxu0 %v5581_v22  ;;  %3060 = vmatpush1.bf16.msra.mxu1 %v5584_v23  ;;  %v5629_v22 = vld [vmem:[#allocation5 + $0xa0] ss:$16 sps:$4 sm:$0xff]   ;;  %v5632_v23 = vld [vmem:[#allocation5 + $0xa8] ss:$16 sps:$4 sm:$0xff]  }
 0x1e5   : > { %2979 = vmatprep.subr.bf16.mxu0 %v5589_v26  ;;  %3061 = vmatprep.subr.bf16.mxu1 %v5592_v27  ;;  %v5640_v26 = vld [vmem:[#allocation5 + $0xcc] ss:$16 sps:$4 sm:$0xff]   ;;  %v5635_v27 = vld [vmem:[#allocation5 + $0xc0] ss:$16 sps:$4 sm:$0xff]   ;;  %v5644_v34 = vld [vmem:[#allocation5 + $0xe8] ss:$16 sps:$4 sm:$0xff]  }
 0x1e6   : > { %v5641_v33 = vld [vmem:[#allocation5 + $0xe0] ss:$16 sps:$4 sm:$0xff]  }
 0x1e8   : > { %2980 = vmatpush1.bf16.msra.mxu0 %v5587_v51  ;;  %3062 = vmatpush1.bf16.msra.mxu1 %v5590_v35  ;;  %v5649_v51 = vld [vmem:[#allocation5 + $0x104] ss:$16 sps:$4 sm:$0xff]   ;;  %v5652_v35 = vld [vmem:[#allocation5 + $0x10c] ss:$16 sps:$4 sm:$0xff]  }
 0x1e9   : > { %v2071_v39 = vpop.f32.mrb[16].mxu0  ;;  %2981 = vmatprep.subr.bf16.mxu0 %v5595_v53  ;;  %3063 = vmatprep.subr.bf16.mxu1 %v5598_v36  ;;  %v5647_v53 = vld [vmem:[#allocation5 + $0x100] ss:$16 sps:$4 sm:$0xff]   ;;  %v5650_v36 = vld [vmem:[#allocation5 + $0x108] ss:$16 sps:$4 sm:$0xff]  }
 0x1ea   : > { %v2030_v41 = vpop.f32.mrb[16].mxu1  ;;  %v2073_v42 = vpop.f32.mrb[17].mxu0 }
 0x1eb   : > { %v2031_v43 = vadd.f32 %v2030_v41, %v1990_v30  ;;  %v2032_v20 = vpop.f32.mrb[17].mxu1  ;;  %v2075_v1 = vpop.f32.mrb[18].mxu0  ;;  %v5638_v30 = vld [vmem:[#allocation5 + $0xc8] ss:$16 sps:$4 sm:$0xff]   ;;  %v5664_v41 = vld [vmem:[#allocation5 + $0x14c] ss:$16 sps:$4 sm:$0xff]  }
 0x1ec   : > { %v2033_v46 = vadd.f32 %v2032_v20, %v1992_v32  ;;  %v2034_v0 = vpop.f32.mrb[18].mxu1  ;;  %v2076_v19 = vpop.f32.mrb[19].mxu0  ;;  %2982 = vmatpush1.bf16.msra.mxu0 %v5593_v21  ;;  %3064 = vmatpush1.bf16.msra.mxu1 %v5596_v24  ;;  %v5646_v32 = vld [vmem:[#allocation5 + $0xec] ss:$16 sps:$4 sm:$0xff]   ;;  %v5655_v21 = vld [vmem:[#allocation5 + $0x124] ss:$16 sps:$4 sm:$0xff]  }
 0x1ed   : > { %v2072_v48 = vadd.f32 %v2071_v39, %v2031_v43  ;;  %v2035_v45 = vpop.f32.mrb[19].mxu1  ;;  %3880 = vmatprep.subr.bf16.mxu0 %v5601_v40  ;;  %3962 = vmatprep.subr.bf16.mxu1 %v5604_v59  ;;  %v5658_v24 = vld [vmem:[#allocation5 + $0x12c] ss:$16 sps:$4 sm:$0xff]   ;;  %v5653_v39 = vld [vmem:[#allocation5 + $0x120] ss:$16 sps:$4 sm:$0xff]  }
 0x1ee   : > { %v2074_v49 = vadd.f32 %v2073_v42, %v2033_v46  ;;  %v5656_v40 = vld [vmem:[#allocation5 + $0x128] ss:$16 sps:$4 sm:$0xff]   ;;  %v5661_v59 = vld [vmem:[#allocation5 + $0x144] ss:$16 sps:$4 sm:$0xff]   ;;  %v5659_v42 = vld [vmem:[#allocation5 + $0x140] ss:$16 sps:$4 sm:$0xff]  }
 0x1ef   : > { %v2102_v29 = vadd.f32 %v2091_v44, %v2072_v48  ;;  %v5662_v43 = vld [vmem:[#allocation5 + $0x148] ss:$16 sps:$4 sm:$0xff]   ;;  %v5667_v20 = vld [vmem:[#allocation5 + $0x164] ss:$16 sps:$4 sm:$0xff]   ;;  %v5670_v44 = vld [vmem:[#allocation5 + $0x16c] ss:$16 sps:$4 sm:$0xff]  }
 0x1f0   : > { %v2103_v50 = vadd.f32 %v2095_v47, %v2074_v49  ;;  %v5665_v1 = vld [vmem:[#allocation5 + $0x160] ss:$16 sps:$4 sm:$0xff]   ;;  %v5668_v46 = vld [vmem:[#allocation5 + $0x168] ss:$16 sps:$4 sm:$0xff]   ;;  %v5673_v0 = vld [vmem:[#allocation5 + $0x184] ss:$16 sps:$4 sm:$0xff]  }
 0x1f1   : > { %vm2106_vm5 = vcmp.gt.f32.partialorder %v2102_v29, 0.0  ;;  %v2110_v54 = vmul.f32 0.2, %v2102_v29  ;;  %v5676_v47 = vld [vmem:[#allocation5 + $0x18c] ss:$16 sps:$4 sm:$0xff]  }
 0x1f2   : > { %v2111_v55 = vmul.f32 0.2, %v2103_v50  ;;  %vm2107_vm6 = vcmp.gt.f32.partialorder %v2103_v50, 0.0  ;;  %v5671_v19 = vld [vmem:[#allocation5 + $0x180] ss:$16 sps:$4 sm:$0xff]  }
 0x1f3   : > { %v2114_v56 = vsel %vm2106_vm5, %v2102_v29, %v2110_v54  ;;  %v5674_v48 = vld [vmem:[#allocation5 + $0x188] ss:$16 sps:$4 sm:$0xff]   ;;  %v5679_v45 = vld [vmem:[#allocation5 + $0x1a4] ss:$16 sps:$4 sm:$0xff]   ;;  %v5682_v49 = vld [vmem:[#allocation5 + $0x1ac] ss:$16 sps:$4 sm:$0xff]  }
 0x1f4   : > { %v2115_v57 = vsel %vm2107_vm6, %v2103_v50, %v2111_v55  ;;  %v2118_v52 = vpack.c.bf16 %v2114_v56, %v2114_v56  ;;  %v5677_v29 = vld [vmem:[#allocation5 + $0x1a0] ss:$16 sps:$4 sm:$0xff]   ;;  %v5680_v50 = vld [vmem:[#allocation5 + $0x1a8] ss:$16 sps:$4 sm:$0xff]   ;;  %v5685_v54 = vld [vmem:[#allocation5 + $0x1c4] ss:$16 sps:$4 sm:$0xff]  }
 0x1f5   : > { %v2119_v58 = vpack.c.bf16 %v2115_v57, %v2115_v57  ;;  %v5688_v55 = vld [vmem:[#allocation5 + $0x1cc] ss:$16 sps:$4 sm:$0xff]   ;;  %v5683_v56 = vld [vmem:[#allocation5 + $0x1c0] ss:$16 sps:$4 sm:$0xff]   ;;  %v5686_v57 = vld [vmem:[#allocation5 + $0x1c8] ss:$16 sps:$4 sm:$0xff]  }
 0x1f7   : > { %2983 = vmatprep.mubr.bf16.mxu0 %v2119_v58  ;;  %3065 = vmatprep.mubr.bf16.mxu1 %v2119_v58  ;;  %v5691_v58 = vld [vmem:[#allocation5 + $0x1e4] ss:$16 sps:$4 sm:$0xff]  }
 0x1f8   : > { %2984 = vmatmul.mubr.bf16.vlgmr.msra.gmra.mrb[20].mxu0 %v2118_v52  ;;  %3066 = vmatmul.mubr.bf16.vlgmr.msra.gmra.mrb[20].mxu1 %v2118_v52  ;;  %v5692_v52 = vld [vmem:[#allocation5 + $0x1e8] ss:$16 sps:$4 sm:$0xff]  }
 0x1f9   : > { %3881 = vmatpush1.bf16.msra.mxu0 %v5599_v60  ;;  %3963 = vmatpush1.bf16.msra.mxu1 %v5602_v61  ;;  %v5694_v60 = vld [vmem:[#allocation5 + $0x1ec] ss:$16 sps:$4 sm:$0xff]   ;;  %v5689_v61 = vld [vmem:[#allocation5 + $0x1e0] ss:$16 sps:$4 sm:$0xff]  }
 0x1fa   : > { %3882 = vmatprep.subr.bf16.mxu0 %v5607_v62  ;;  %3964 = vmatprep.subr.bf16.mxu1 %v5610_v63  ;;  %v5697_v62 = vld [vmem:[#allocation5 + $0x204] ss:$16 sps:$4 sm:$0xff]   ;;  %v5700_v63 = vld [vmem:[#allocation5 + $0x20c] ss:$16 sps:$4 sm:$0xff]  }
 0x1fd   : > { %3883 = vmatpush1.bf16.msra.mxu0 %v5605_v3  ;;  %3965 = vmatpush1.bf16.msra.mxu1 %v5608_v4  ;;  %v6754_v3 = vld [vmem:[%s6884_s6] sm:$0xf] }
 0x1fe   : > { %3884 = vmatprep.subr.bf16.mxu0 %v5613_v5  ;;  %3966 = vmatprep.subr.bf16.mxu1 %v5616_v6  ;;  %v2253_v4 = vrot.slane %v6754_v3, %v6719_v28  ;;  %v2257_v5 = vrot.slane %v6754_v3, %v6727_v2  ;;  %v2265_v6 = vrot.slane %v6754_v3, %v6745_v38 }
 0x201   : > { %3885 = vmatpush1.bf16.msra.mxu0 %v5611_v7  ;;  %3967 = vmatpush1.bf16.msra.mxu1 %v5614_v8 }
 0x202   : > { %3886 = vmatprep.subr.bf16.mxu0 %v5619_v9  ;;  %3968 = vmatprep.subr.bf16.mxu1 %v5622_v10 }
 0x205   : > { %3887 = vmatpush1.bf16.msra.mxu0 %v5617_v11  ;;  %3969 = vmatpush1.bf16.msra.mxu1 %v5620_v12 }
 0x206   : > { %3888 = vmatprep.subr.bf16.mxu0 %v5625_v13  ;;  %3970 = vmatprep.subr.bf16.mxu1 %v5628_v14 }
 0x209   : > { %3889 = vmatpush1.bf16.msra.mxu0 %v5623_v15  ;;  %3971 = vmatpush1.bf16.msra.mxu1 %v5626_v16 }
 0x20a   : > { %3890 = vmatprep.subr.bf16.mxu0 %v5631_v17  ;;  %3972 = vmatprep.subr.bf16.mxu1 %v5634_v18 }
 0x20d   : > { %3891 = vmatpush1.bf16.msra.mxu0 %v5629_v22  ;;  %3973 = vmatpush1.bf16.msra.mxu1 %v5632_v23 }
 0x20e   : > { %3892 = vmatprep.subr.bf16.mxu0 %v5637_v25  ;;  %3974 = vmatprep.subr.bf16.mxu1 %v5640_v26 }
 0x211   : > { %3893 = vmatpush1.bf16.msra.mxu0 %v5635_v27  ;;  %3975 = vmatpush1.bf16.msra.mxu1 %v5638_v30  ;;  %v5695_v30 = vld [vmem:[#allocation5 + $0x200] ss:$16 sps:$4 sm:$0xff]  }
 0x212   : > { %3894 = vmatprep.subr.bf16.mxu0 %v5643_v31  ;;  %3976 = vmatprep.subr.bf16.mxu1 %v5646_v32  ;;  %v5698_v31 = vld [vmem:[#allocation5 + $0x208] ss:$16 sps:$4 sm:$0xff]  }
 0x215   : > { %3895 = vmatpush1.bf16.msra.mxu0 %v5641_v33  ;;  %3977 = vmatpush1.bf16.msra.mxu1 %v5644_v34  ;;  %v5703_v34 = vld [vmem:[#allocation5 + $0x224] ss:$16 sps:$4 sm:$0xff]  }
 0x216   : > { %3896 = vmatprep.subr.bf16.mxu0 %v5649_v51  ;;  %3978 = vmatprep.subr.bf16.mxu1 %v5652_v35  ;;  %v5706_v51 = vld [vmem:[#allocation5 + $0x22c] ss:$16 sps:$4 sm:$0xff]  }
 0x219   : > { %3897 = vmatpush1.bf16.msra.mxu0 %v5647_v53  ;;  %3979 = vmatpush1.bf16.msra.mxu1 %v5650_v36  ;;  %v5701_v53 = vld [vmem:[#allocation5 + $0x220] ss:$16 sps:$4 sm:$0xff]   ;;  %v5704_v36 = vld [vmem:[#allocation5 + $0x228] ss:$16 sps:$4 sm:$0xff]  }
 0x21a   : > { %3898 = vmatprep.subr.bf16.mxu0 %v5655_v21  ;;  %3980 = vmatprep.subr.bf16.mxu1 %v5658_v24  ;;  %v5709_v21 = vld [vmem:[#allocation5 + $0x244] ss:$16 sps:$4 sm:$0xff]   ;;  %v5712_v24 = vld [vmem:[#allocation5 + $0x24c] ss:$16 sps:$4 sm:$0xff]  }
 0x21d   : > { %3899 = vmatpush1.bf16.msra.mxu0 %v5653_v39  ;;  %3981 = vmatpush1.bf16.msra.mxu1 %v5656_v40  ;;  %v5707_v39 = vld [vmem:[#allocation5 + $0x240] ss:$16 sps:$4 sm:$0xff]   ;;  %v5710_v40 = vld [vmem:[#allocation5 + $0x248] ss:$16 sps:$4 sm:$0xff]  }
 0x21e   : > { %3900 = vmatprep.subr.bf16.mxu0 %v5661_v59  ;;  %3982 = vmatprep.subr.bf16.mxu1 %v5664_v41  ;;  %v5715_v59 = vld [vmem:[#allocation5 + $0x264] ss:$16 sps:$4 sm:$0xff]   ;;  %v5718_v41 = vld [vmem:[#allocation5 + $0x26c] ss:$16 sps:$4 sm:$0xff]  }
 0x221   : > { %3901 = vmatpush1.bf16.msra.mxu0 %v5659_v42  ;;  %3983 = vmatpush1.bf16.msra.mxu1 %v5662_v43  ;;  %v5713_v42 = vld [vmem:[#allocation5 + $0x260] ss:$16 sps:$4 sm:$0xff]   ;;  %v5716_v43 = vld [vmem:[#allocation5 + $0x268] ss:$16 sps:$4 sm:$0xff]  }
 0x222   : > { %3902 = vmatprep.subr.bf16.mxu0 %v5667_v20  ;;  %3984 = vmatprep.subr.bf16.mxu1 %v5670_v44  ;;  %v5721_v20 = vld [vmem:[#allocation5 + $0x284] ss:$16 sps:$4 sm:$0xff]   ;;  %v5724_v44 = vld [vmem:[#allocation5 + $0x28c] ss:$16 sps:$4 sm:$0xff]  }
 0x225   : > { %3903 = vmatpush1.bf16.msra.mxu0 %v5665_v1  ;;  %3985 = vmatpush1.bf16.msra.mxu1 %v5668_v46  ;;  %v5719_v1 = vld [vmem:[#allocation5 + $0x280] ss:$16 sps:$4 sm:$0xff]   ;;  %v5722_v46 = vld [vmem:[#allocation5 + $0x288] ss:$16 sps:$4 sm:$0xff]  }
 0x226   : > { %3904 = vmatprep.subr.bf16.mxu0 %v5673_v0  ;;  %3986 = vmatprep.subr.bf16.mxu1 %v5676_v47  ;;  %v5727_v0 = vld [vmem:[#allocation5 + $0x2a4] ss:$16 sps:$4 sm:$0xff]   ;;  %v5730_v47 = vld [vmem:[#allocation5 + $0x2ac] ss:$16 sps:$4 sm:$0xff]  }
 0x229   : > { %3905 = vmatpush1.bf16.msra.mxu0 %v5671_v19  ;;  %3987 = vmatpush1.bf16.msra.mxu1 %v5674_v48  ;;  %v5725_v19 = vld [vmem:[#allocation5 + $0x2a0] ss:$16 sps:$4 sm:$0xff]   ;;  %v5728_v48 = vld [vmem:[#allocation5 + $0x2a8] ss:$16 sps:$4 sm:$0xff]  }
 0x22a   : > { %3906 = vmatprep.subr.bf16.mxu0 %v5679_v45  ;;  %3988 = vmatprep.subr.bf16.mxu1 %v5682_v49  ;;  %v5733_v45 = vld [vmem:[#allocation5 + $0x2c4] ss:$16 sps:$4 sm:$0xff]   ;;  %v5736_v49 = vld [vmem:[#allocation5 + $0x2cc] ss:$16 sps:$4 sm:$0xff]  }
 0x22d   : > { %3907 = vmatpush1.bf16.msra.mxu0 %v5677_v29  ;;  %3989 = vmatpush1.bf16.msra.mxu1 %v5680_v50  ;;  %v5731_v29 = vld [vmem:[#allocation5 + $0x2c0] ss:$16 sps:$4 sm:$0xff]   ;;  %v5734_v50 = vld [vmem:[#allocation5 + $0x2c8] ss:$16 sps:$4 sm:$0xff]  }
 0x22e   : > { %3908 = vmatprep.subr.bf16.mxu0 %v5685_v54  ;;  %3990 = vmatprep.subr.bf16.mxu1 %v5688_v55  ;;  %v5739_v54 = vld [vmem:[#allocation5 + $0x2e4] ss:$16 sps:$4 sm:$0xff]   ;;  %v5742_v55 = vld [vmem:[#allocation5 + $0x2ec] ss:$16 sps:$4 sm:$0xff]  }
 0x231   : > { %3909 = vmatpush1.bf16.msra.mxu0 %v5683_v56  ;;  %3991 = vmatpush1.bf16.msra.mxu1 %v5686_v57  ;;  %v5737_v56 = vld [vmem:[#allocation5 + $0x2e0] ss:$16 sps:$4 sm:$0xff]   ;;  %v5740_v57 = vld [vmem:[#allocation5 + $0x2e8] ss:$16 sps:$4 sm:$0xff]  }
 0x232   : > { %3910 = vmatprep.subr.bf16.mxu0 %v5691_v58  ;;  %3992 = vmatprep.subr.bf16.mxu1 %v5694_v60  ;;  %v5745_v58 = vld [vmem:[#allocation5 + $0x304] ss:$16 sps:$4 sm:$0xff]   ;;  %v5748_v60 = vld [vmem:[#allocation5 + $0x30c] ss:$16 sps:$4 sm:$0xff]  }
 0x235   : > { %3911 = vmatpush1.bf16.msra.mxu0 %v5689_v61  ;;  %3993 = vmatpush1.bf16.msra.mxu1 %v5692_v52  ;;  %v5743_v61 = vld [vmem:[#allocation5 + $0x300] ss:$16 sps:$4 sm:$0xff]   ;;  %v5746_v52 = vld [vmem:[#allocation5 + $0x308] ss:$16 sps:$4 sm:$0xff]  }
 0x236   : > { %3921 = vmatprep.subr.bf16.mxu0 %v5697_v62  ;;  %4003 = vmatprep.subr.bf16.mxu1 %v5700_v63  ;;  %v5751_v62 = vld [vmem:[#allocation5 + $0x324] ss:$16 sps:$4 sm:$0xff]   ;;  %v5754_v63 = vld [vmem:[#allocation5 + $0x32c] ss:$16 sps:$4 sm:$0xff]  }
 0x2cb   : > { %v2985_v7 = vpop.f32.mrb[20].mxu0  ;;  %v6762_v8 = vpop.f32.mrb[20].mxu1 }
 0x2cc   : > { %v5050_v9 = vadd.f32 %v2985_v7, %v2253_v4  ;;  %v2987_v10 = vpop.f32.mrb[21].mxu0  ;;  %v3069_v11 = vpop.f32.mrb[21].mxu1  ;;  %v5749_v4 = vld [vmem:[#allocation5 + $0x320] ss:$16 sps:$4 sm:$0xff]   ;;  %v5760_v7 = vld [vmem:[#allocation5 + $0x34c] ss:$16 sps:$4 sm:$0xff]  }
 0x2cd   : > { %v5051_v12 = vadd.f32 %v2987_v10, %v2257_v5  ;;  %v5053_v13 = vadd.f32 %v3069_v11, %v2265_v6  ;;  %v2989_v14 = vpop.f32.mrb[22].mxu0  ;;  %v3071_v15 = vpop.f32.mrb[22].mxu1  ;;  %v5752_v5 = vld [vmem:[#allocation5 + $0x328] ss:$16 sps:$4 sm:$0xff]   ;;  %v5757_v6 = vld [vmem:[#allocation5 + $0x344] ss:$16 sps:$4 sm:$0xff]  }
 0x2ce   : > { %vm3074_vm7 = vcmp.gt.f32.partialorder %v5050_v9, 0.0  ;;  %v3078_v16 = vmul.f32 0.2, %v5050_v9  ;;  %v2990_v23 = vpop.f32.mrb[23].mxu0  ;;  %v3072_v25 = vpop.f32.mrb[23].mxu1 }
 0x2cf   : > { %vm3075_vm8 = vcmp.gt.f32.partialorder %v5051_v12, 0.0  ;;  %v3079_v17 = vmul.f32 0.2, %v5051_v12  ;;  %vm3077_vm9 = vcmp.gt.f32.partialorder %v5053_v13, 0.0  ;;  %v3081_v18 = vmul.f32 0.2, %v5053_v13 }
 0x2d0   : > { %v3082_v22 = vsel %vm3074_vm7, %v5050_v9, %v3078_v16  ;;  %v5755_v9 = vld [vmem:[#allocation5 + $0x340] ss:$16 sps:$4 sm:$0xff]   ;;  %v5758_v10 = vld [vmem:[#allocation5 + $0x348] ss:$16 sps:$4 sm:$0xff]   ;;  %v5763_v11 = vld [vmem:[#allocation5 + $0x364] ss:$16 sps:$4 sm:$0xff]   ;;  %v2261_v25 = vrot.slane %v6754_v3, %v6742_v37 }
 0x2d1   : > { %v3083_v26 = vsel %vm3075_vm8, %v5051_v12, %v3079_v17  ;;  %v3085_v32 = vsel %vm3077_vm9, %v5053_v13, %v3081_v18  ;;  %v3086_v33 = vpack.c.bf16 %v3082_v22, %v3082_v22  ;;  %v5766_v12 = vld [vmem:[#allocation5 + $0x36c] ss:$16 sps:$4 sm:$0xff]   ;;  %v5761_v13 = vld [vmem:[#allocation5 + $0x360] ss:$16 sps:$4 sm:$0xff]   ;;  %v5764_v14 = vld [vmem:[#allocation5 + $0x368] ss:$16 sps:$4 sm:$0xff]  }
 0x2d2   : > { %v3087_v27 = vpack.c.bf16 %v3083_v26, %v3083_v26  ;;  %v3089_v35 = vpack.c.bf16 %v3085_v32, %v3085_v32  ;;  %v5769_v15 = vld [vmem:[#allocation5 + $0x384] ss:$16 sps:$4 sm:$0xff]   ;;  %v5772_v16 = vld [vmem:[#allocation5 + $0x38c] ss:$16 sps:$4 sm:$0xff]   ;;  %v5767_v17 = vld [vmem:[#allocation5 + $0x380] ss:$16 sps:$4 sm:$0xff]   ;;  %v5052_v32 = vadd.f32 %v6762_v8, %v2261_v25 }
 0x2d3   : > { %v5770_v18 = vld [vmem:[#allocation5 + $0x388] ss:$16 sps:$4 sm:$0xff]   ;;  %v5775_v22 = vld [vmem:[#allocation5 + $0x3a4] ss:$16 sps:$4 sm:$0xff]   ;;  %v5778_v23 = vld [vmem:[#allocation5 + $0x3ac] ss:$16 sps:$4 sm:$0xff]  }
 0x2d4   : > { %3912 = vmatprep.mubr.bf16.mxu0 %v3087_v27  ;;  %3994 = vmatprep.mubr.bf16.mxu1 %v3087_v27  ;;  %v5773_v26 = vld [vmem:[#allocation5 + $0x3a0] ss:$16 sps:$4 sm:$0xff]   ;;  %v5776_v27 = vld [vmem:[#allocation5 + $0x3a8] ss:$16 sps:$4 sm:$0xff]   ;;  %vm3076_vm10 = vcmp.gt.f32.partialorder %v5052_v32, 0.0 }
 0x2d5   : > { %3913 = vmatmul.mubr.bf16.vlgmr.msra.gmra.mrb[24].mxu0 %v3086_v33  ;;  %3995 = vmatmul.mubr.bf16.vlgmr.msra.gmra.mrb[24].mxu1 %v3086_v33  ;;  %v5779_v33 = vld [vmem:[#allocation5 + $0x3c0] ss:$16 sps:$4 sm:$0xff]  }
 0x2d6   : > { %3922 = vmatpush1.bf16.msra.mxu0 %v5695_v30  ;;  %4004 = vmatpush1.bf16.msra.mxu1 %v5698_v31  ;;  %v5781_v30 = vld [vmem:[#allocation5 + $0x3c4] ss:$16 sps:$4 sm:$0xff]   ;;  %v5784_v31 = vld [vmem:[#allocation5 + $0x3cc] ss:$16 sps:$4 sm:$0xff]   ;;  %v5785_v3 = vld [vmem:[#allocation5 + $0x3e0] ss:$16 sps:$4 sm:$0xff]  }
 0x2d7   : > { %3953 = vmatprep.mubr.bf16.mxu0 %v3089_v35  ;;  %4035 = vmatprep.mubr.bf16.mxu1 %v3089_v35  ;;  %v5790_v35 = vld [vmem:[#allocation5 + $0x3ec] ss:$16 sps:$4 sm:$0xff]  }
 0x2d8   : > { %3923 = vmatprep.subr.bf16.mxu0 %v5703_v34  ;;  %4005 = vmatprep.subr.bf16.mxu1 %v5706_v51  ;;  %v5782_v34 = vld [vmem:[#allocation5 + $0x3c8] ss:$16 sps:$4 sm:$0xff]   ;;  %v5787_v51 = vld [vmem:[#allocation5 + $0x3e4] ss:$16 sps:$4 sm:$0xff]  }
 0x2d9   : > { %v5791_v8 = vld [vmem:[%s6887_s9 + $0x40] sm:$0xff]  }
 0x2da   : > { %3924 = vmatpush1.bf16.msra.mxu0 %v5701_v53  ;;  %4006 = vmatpush1.bf16.msra.mxu1 %v5704_v36  ;;  %v3080_v53 = vmul.f32 0.2, %v5052_v32  ;;  %v5788_v36 = vld [vmem:[#allocation5 + $0x3e8] ss:$16 sps:$4 sm:$0xff]  }
 0x2db   : > { %3925 = vmatprep.subr.bf16.mxu0 %v5709_v21  ;;  %4007 = vmatprep.subr.bf16.mxu1 %v5712_v24  ;;  %v5792_v21 = vld [vmem:[%s6887_s9 + $0xc0] sm:$0xff]  }
 0x2dc   : > { %v3084_v24 = vsel %vm3076_vm10, %v5052_v32, %v3080_v53 }
 0x2de   : > { %3926 = vmatpush1.bf16.msra.mxu0 %v5707_v39  ;;  %4008 = vmatpush1.bf16.msra.mxu1 %v5710_v40  ;;  %v5793_v39 = vld [vmem:[%s6887_s9] sm:$0xff]  }
 0x2df   : > { %3927 = vmatprep.subr.bf16.mxu0 %v5715_v59  ;;  %4009 = vmatprep.subr.bf16.mxu1 %v5718_v41  ;;  %v5794_v40 = vld [vmem:[%s6887_s9 + $0x80] sm:$0xff]   ;;  %v3088_v59 = vpack.c.bf16 %v3084_v24, %v3084_v24  ;;  %v5795_v41 = vld [vmem:[%s6887_s9 + $0x48] sm:$0xff]  }
 0x2e2   : > { %3928 = vmatpush1.bf16.msra.mxu0 %v5713_v42  ;;  %4010 = vmatpush1.bf16.msra.mxu1 %v5716_v43  ;;  %v5796_v42 = vld [vmem:[%s6887_s9 + $0xc8] sm:$0xff]  }
 0x2e3   : > { %3929 = vmatprep.subr.bf16.mxu0 %v5721_v20  ;;  %4011 = vmatprep.subr.bf16.mxu1 %v5724_v44  ;;  %v5797_v43 = vld [vmem:[%s6887_s9 + $0x8] sm:$0xff]   ;;  %v5799_v44 = vld [vmem:[%s6887_s9 + $0x50] sm:$0xff]  }
 0x2e4   : > { %v5798_v20 = vld [vmem:[%s6887_s9 + $0x88] sm:$0xff]  }
 0x2e6   : > { %3930 = vmatpush1.bf16.msra.mxu0 %v5719_v1  ;;  %4012 = vmatpush1.bf16.msra.mxu1 %v5722_v46  ;;  %v5800_v1 = vld [vmem:[%s6887_s9 + $0xd0] sm:$0xff]  }
 0x2e7   : > { %3931 = vmatprep.subr.bf16.mxu0 %v5727_v0  ;;  %4013 = vmatprep.subr.bf16.mxu1 %v5730_v47  ;;  %v5801_v46 = vld [vmem:[%s6887_s9 + $0x10] sm:$0xff]   ;;  %v5803_v47 = vld [vmem:[%s6887_s9 + $0x58] sm:$0xff]  }
 0x2e8   : > { %v5802_v0 = vld [vmem:[%s6887_s9 + $0x90] sm:$0xff]  }
 0x2ea   : > { %3932 = vmatpush1.bf16.msra.mxu0 %v5725_v19  ;;  %4014 = vmatpush1.bf16.msra.mxu1 %v5728_v48  ;;  %v5804_v19 = vld [vmem:[%s6887_s9 + $0xd8] sm:$0xff]  }
 0x2eb   : > { %3933 = vmatprep.subr.bf16.mxu0 %v5733_v45  ;;  %4015 = vmatprep.subr.bf16.mxu1 %v5736_v49  ;;  %v5805_v48 = vld [vmem:[%s6887_s9 + $0x18] sm:$0xff]   ;;  %v5807_v49 = vld [vmem:[%s6887_s9 + $0x60] sm:$0xff]  }
 0x2ec   : > { %v5806_v45 = vld [vmem:[%s6887_s9 + $0x98] sm:$0xff]  }
 0x2ee   : > { %3934 = vmatpush1.bf16.msra.mxu0 %v5731_v29  ;;  %4016 = vmatpush1.bf16.msra.mxu1 %v5734_v50  ;;  %v5808_v29 = vld [vmem:[%s6887_s9 + $0xe0] sm:$0xff]  }
 0x2ef   : > { %3935 = vmatprep.subr.bf16.mxu0 %v5739_v54  ;;  %4017 = vmatprep.subr.bf16.mxu1 %v5742_v55  ;;  %v5809_v50 = vld [vmem:[%s6887_s9 + $0x20] sm:$0xff]   ;;  %v5811_v55 = vld [vmem:[%s6887_s9 + $0x68] sm:$0xff]  }
 0x2f0   : > { %v5810_v54 = vld [vmem:[%s6887_s9 + $0xa0] sm:$0xff]  }
 0x2f2   : > { %3936 = vmatpush1.bf16.msra.mxu0 %v5737_v56  ;;  %4018 = vmatpush1.bf16.msra.mxu1 %v5740_v57  ;;  %v5812_v56 = vld [vmem:[%s6887_s9 + $0xe8] sm:$0xff]  }
 0x2f3   : > { %3937 = vmatprep.subr.bf16.mxu0 %v5745_v58  ;;  %4019 = vmatprep.subr.bf16.mxu1 %v5748_v60  ;;  %v5813_v57 = vld [vmem:[%s6887_s9 + $0x28] sm:$0xff]   ;;  %v5815_v60 = vld [vmem:[%s6887_s9 + $0x70] sm:$0xff]  }
 0x2f4   : > { %v5814_v58 = vld [vmem:[%s6887_s9 + $0xa8] sm:$0xff]  }
 0x2f6   : > { %3938 = vmatpush1.bf16.msra.mxu0 %v5743_v61  ;;  %4020 = vmatpush1.bf16.msra.mxu1 %v5746_v52  ;;  %v5816_v61 = vld [vmem:[%s6887_s9 + $0xf0] sm:$0xff]  }
 0x2f7   : > { %3939 = vmatprep.subr.bf16.mxu0 %v5751_v62  ;;  %4021 = vmatprep.subr.bf16.mxu1 %v5754_v63  ;;  %v5817_v52 = vld [vmem:[%s6887_s9 + $0x30] sm:$0xff]   ;;  %v5819_v63 = vld [vmem:[%s6887_s9 + $0x78] sm:$0xff]  }
 0x2f8   : > { %v5818_v62 = vld [vmem:[%s6887_s9 + $0xb0] sm:$0xff]  }
 0x2fa   : > { %3940 = vmatpush1.bf16.msra.mxu0 %v5749_v4  ;;  %4022 = vmatpush1.bf16.msra.mxu1 %v5752_v5  ;;  %v5820_v4 = vld [vmem:[%s6887_s9 + $0xf8] sm:$0xff]  }
 0x2fb   : > { %3941 = vmatprep.subr.bf16.mxu0 %v5757_v6  ;;  %4023 = vmatprep.subr.bf16.mxu1 %v5760_v7  ;;  %v5821_v5 = vld [vmem:[%s6887_s9 + $0x38] sm:$0xff]   ;;  %v3218_v7 = vld [vmem:[%s6886_s8] sm:$0xf] }
 0x2fc   : > { %v5822_v6 = vld [vmem:[%s6887_s9 + $0xb8] sm:$0xff]  }
 0x2fe   : > { %3942 = vmatpush1.bf16.msra.mxu0 %v5755_v9  ;;  %4024 = vmatpush1.bf16.msra.mxu1 %v5758_v10  ;;  %v3223_v9 = vrot.slane %v3218_v7, %v6719_v28  ;;  %v3231_v10 = vrot.slane %v3218_v7, %v6742_v37 }
 0x2ff   : > { %3943 = vmatprep.subr.bf16.mxu0 %v5763_v11  ;;  %4025 = vmatprep.subr.bf16.mxu1 %v5766_v12  ;;  %v3227_v11 = vrot.slane %v3218_v7, %v6727_v2  ;;  %v3235_v12 = vrot.slane %v3218_v7, %v6745_v38 }
 0x302   : > { %3944 = vmatpush1.bf16.msra.mxu0 %v5761_v13  ;;  %4026 = vmatpush1.bf16.msra.mxu1 %v5764_v14 }
 0x303   : > { %3945 = vmatprep.subr.bf16.mxu0 %v5769_v15  ;;  %4027 = vmatprep.subr.bf16.mxu1 %v5772_v16 }
 0x306   : > { %3946 = vmatpush1.bf16.msra.mxu0 %v5767_v17  ;;  %4028 = vmatpush1.bf16.msra.mxu1 %v5770_v18 }
 0x307   : > { %3947 = vmatprep.subr.bf16.mxu0 %v5775_v22  ;;  %4029 = vmatprep.subr.bf16.mxu1 %v5778_v23 }
 0x30a   : > { %3948 = vmatpush1.bf16.msra.mxu0 %v5773_v26  ;;  %4030 = vmatpush1.bf16.msra.mxu1 %v5776_v27 }
 0x30b   : > { %3949 = vmatprep.subr.bf16.mxu0 %v5781_v30  ;;  %4031 = vmatprep.subr.bf16.mxu1 %v5784_v31 }
 0x30e   : > { %3950 = vmatpush1.bf16.msra.mxu0 %v5779_v33  ;;  %4032 = vmatpush1.bf16.msra.mxu1 %v5782_v34 }
 0x30f   : > { %3951 = vmatprep.subr.bf16.mxu0 %v5787_v51  ;;  %4033 = vmatprep.subr.bf16.mxu1 %v5790_v35 }
 0x312   : > { %3952 = vmatpush1.bf16.msra.mxu0 %v5785_v3  ;;  %4034 = vmatpush1.bf16.msra.mxu1 %v5788_v36 }
 0x313   : > { %5006 = vmatprep.subr.bf16.mxu0 %v5791_v8  ;;  %5028 = vmatprep.subr.bf16.mxu1 %v5792_v21  ;;  %v4971_v21 = vld [vmem:[#allocation2] ss:$0 sm:$0xff] }
 0x315   : > { %3954 = vmatmul.mubr.bf16.vlgmr.msra.gmra.mrb[24].mxu0 %v3088_v59  ;;  %4036 = vmatmul.mubr.bf16.vlgmr.msra.gmra.mrb[24].mxu1 %v3088_v59 }
 0x316   : > { %5007 = vmatpush3.bf16.msra.mxu0 %v5793_v39  ;;  %5029 = vmatpush3.bf16.msra.mxu1 %v5794_v40 }
 0x317   : > { %5008 = vmatprep.subr.bf16.mxu0 %v5795_v41  ;;  %5030 = vmatprep.subr.bf16.mxu1 %v5796_v42 }
 0x31a   : > { %5009 = vmatpush3.bf16.msra.mxu0 %v5797_v43  ;;  %5031 = vmatpush3.bf16.msra.mxu1 %v5798_v20 }
 0x31b   : > { %5010 = vmatprep.subr.bf16.mxu0 %v5799_v44  ;;  %5032 = vmatprep.subr.bf16.mxu1 %v5800_v1 }
 0x31e   : > { %5011 = vmatpush3.bf16.msra.mxu0 %v5801_v46  ;;  %5033 = vmatpush3.bf16.msra.mxu1 %v5802_v0 }
 0x31f   : > { %5012 = vmatprep.subr.bf16.mxu0 %v5803_v47  ;;  %5034 = vmatprep.subr.bf16.mxu1 %v5804_v19 }
 0x322   : > { %5013 = vmatpush3.bf16.msra.mxu0 %v5805_v48  ;;  %5035 = vmatpush3.bf16.msra.mxu1 %v5806_v45 }
 0x323   : > { %5014 = vmatprep.subr.bf16.mxu0 %v5807_v49  ;;  %5036 = vmatprep.subr.bf16.mxu1 %v5808_v29 }
 0x326   : > { %5015 = vmatpush3.bf16.msra.mxu0 %v5809_v50  ;;  %5037 = vmatpush3.bf16.msra.mxu1 %v5810_v54 }
 0x327   : > { %5016 = vmatprep.subr.bf16.mxu0 %v5811_v55  ;;  %5038 = vmatprep.subr.bf16.mxu1 %v5812_v56 }
 0x32a   : > { %5017 = vmatpush3.bf16.msra.mxu0 %v5813_v57  ;;  %5039 = vmatpush3.bf16.msra.mxu1 %v5814_v58 }
 0x32b   : > { %5018 = vmatprep.subr.bf16.mxu0 %v5815_v60  ;;  %5040 = vmatprep.subr.bf16.mxu1 %v5816_v61 }
 0x32e   : > { %5019 = vmatpush3.bf16.msra.mxu0 %v5817_v52  ;;  %5041 = vmatpush3.bf16.msra.mxu1 %v5818_v62 }
 0x32f   : > { %5020 = vmatprep.subr.bf16.mxu0 %v5819_v63  ;;  %5042 = vmatprep.subr.bf16.mxu1 %v5820_v4 }
 0x332   : > { %5021 = vmatpush3.bf16.msra.mxu0 %v5821_v5  ;;  %5043 = vmatpush3.bf16.msra.mxu1 %v5822_v6 }
 0x3e8   : > { %v3955_v13 = vpop.f32.mrb[24].mxu0  ;;  %v4037_v14 = vpop.f32.mrb[24].mxu1 }
 0x3e9   : > { %v5054_v15 = vadd.f32 %v3955_v13, %v3223_v9  ;;  %v5056_v16 = vadd.f32 %v4037_v14, %v3231_v10  ;;  %v3957_v17 = vpop.f32.mrb[25].mxu0  ;;  %v4039_v18 = vpop.f32.mrb[25].mxu1 }
 0x3ea   : > { %v5055_v22 = vadd.f32 %v3957_v17, %v3227_v11  ;;  %v5057_v23 = vadd.f32 %v4039_v18, %v3235_v12  ;;  %v3959_v25 = vpop.f32.mrb[26].mxu0  ;;  %v4041_v26 = vpop.f32.mrb[26].mxu1 }
 0x3eb   : > { %vm4044_vm11 = vcmp.gt.f32.partialorder %v5054_v15, 0.0  ;;  %v4048_v27 = vmul.f32 0.2, %v5054_v15  ;;  %vm4046_vm12 = vcmp.gt.f32.partialorder %v5056_v16, 0.0  ;;  %v4050_v28 = vmul.f32 0.2, %v5056_v16 }
 0x3ec   : > { %vm4045_vm13 = vcmp.gt.f32.partialorder %v5055_v22, 0.0  ;;  %v4049_v37 = vmul.f32 0.2, %v5055_v22  ;;  %vm4047_vm14 = vcmp.gt.f32.partialorder %v5057_v23, 0.0  ;;  %v4051_v2 = vmul.f32 0.2, %v5057_v23 }
 0x3ed   : > { %v4052_v30 = vsel %vm4044_vm11, %v5054_v15, %v4048_v27  ;;  %v4054_v38 = vsel %vm4046_vm12, %v5056_v16, %v4050_v28  ;;  %v3960_v31 = vpop.f32.mrb[27].mxu0  ;;  %v4042_v32 = vpop.f32.mrb[27].mxu1 }
 0x3ee   : > { %v4053_v33 = vsel %vm4045_vm13, %v5055_v22, %v4049_v37  ;;  %v4055_v34 = vsel %vm4047_vm14, %v5057_v23, %v4051_v2  ;;  %v4056_v53 = vpack.c.bf16 %v4052_v30, %v4052_v30  ;;  %v4058_v3 = vpack.c.bf16 %v4054_v38, %v4054_v38 }
 0x3ef   : > { %v4057_v51 = vpack.c.bf16 %v4053_v33, %v4053_v33  ;;  %v4059_v35 = vpack.c.bf16 %v4055_v34, %v4055_v34 }
 0x3f1   : > { %4355 = vmatprep.mubr.bf16.mxu0 %v4057_v51  ;;  %4395 = vmatprep.mubr.bf16.mxu1 %v4059_v35 }
 0x3f2   : > { %4356 = vmatmul.mubr.bf16.vlgmr.msra.gmra.mrb[28].mxu0 %v4056_v53  ;;  %4396 = vmatmul.mubr.bf16.vlgmr.msra.gmra.mrb[28].mxu1 %v4058_v3 }
 0x4c5   : > { %v5022_v36 = vpop.f32.mrb[28].mxu0  ;;  %v5044_v8 = vpop.f32.mrb[28].mxu1 }
 0x4c6   : > { %v5023_v24 = vpop.f32.mrb[29].mxu0  ;;  %v5045_v39 = vpop.f32.mrb[29].mxu1 }
 0x4c7   : > { %v5024_v40 = vadd.f32 %v5023_v24, %v5022_v36  ;;  %v5046_v59 = vadd.f32 %v5045_v39, %v5044_v8  ;;  %v5025_v41 = vpop.f32.mrb[30].mxu0  ;;  %v5047_v42 = vpop.f32.mrb[30].mxu1 }
 0x4c8   : > { %v5026_v43 = vpop.f32.mrb[31].mxu0  ;;  %v5048_v20 = vpop.f32.mrb[31].mxu1 }
 0x4c9   : > { %v4358_v44 = vadd.f32 %v5024_v40, %v4971_v21 }
 0x4cb   : > { %v4398_v1 = vadd.f32 %v5046_v59, %v4358_v44 }
 0x4cd   : > { %v4403_v46 = vsub.f32 0.0, %v4398_v1 }
 0x4cf   : > { %v4404_v0 = vmul.f32 1.442695, %v4403_v46 }
 0x4d1   : > { %5823 = vpow2.f32 %v4404_v0 }
 0x4db   : > { %v5824_v47 = vpop.eup %5823 }
 0x4dc   : > { %v4406_v19 = vadd.f32 1.0, %v5824_v47 }
 0x4de   : > { %5825 = vrcp.f32 %v4406_v19 }
 0x4e8   : > { %v5826_v48 = vpop.eup %5825 }
 0x4e9   : > { %4409 = vst.msk [vmem:[%s433_s30] sm:$0xff] %vm4408_vm15, %v5826_v48 }
 0x4ea PF: > { %s25_s19 = sadd.s32 1, %s5897_s19  }
 0x4eb   : > { %p22_p5 = scmp.ge.s32.totalorder %s25_s19, 4  }
 0x4ed   :  { %24 = sbr.rel (!%p22_p5) target bundleno = 5 (0x5), region = 106 }
 0x4f4   :  { %4429 = vsyncpa [#allocation4], 1 }
 0x4f5   :  { %4431 = vsyncpa [#allocation4 + $0x1], 1 }
 0x4f6   :  { %4432 = vsyncpa [#allocation6], 1 }

</bundles_post_ra>
